<compile_context>
chip_gen: v5e
topology: v5e:2x2
jax: 0.10.0
libtpu: 0.0.40
codegen_flags: <defaults>
</compile_context>

<pallas_src>
import jax
import jax.numpy as jnp
import numpy as np
from jax.experimental import pallas as pl
from jax.experimental.pallas import tpu as pltpu


def _conv3x3_s2_kernel(w_ref, b_ref, pee_ref, peo_ref, poe_ref, poo_ref, o_ref):
    """Fused 3x3 / stride-2 conv for one batch element.

    w_ref : SMEM (O*C*9,) f32, flattened (o, c, kh, kw) row-major
    b_ref : SMEM (O,)      f32
    p*_ref: VMEM (1, C, Hh, Wh) f32 parity planes of the padded input
            (ee = even-row/even-col, eo = even-row/odd-col, ...)
    o_ref : VMEM (1, O, Ho, Wo) f32 output (NCHW; W_out on lanes)
    """
    _, C, _, _ = pee_ref.shape
    _, O, Ho, Wo = o_ref.shape
    planes = {(0, 0): pee_ref, (0, 1): peo_ref,
              (1, 0): poe_ref, (1, 1): poo_ref}

    # bias folded into the accumulator init (one splat per output channel)
    accs = [jnp.zeros((Ho, Wo), jnp.float32) + b_ref[o] for o in range(O)]

    # TODO(synk): for large C, switch the channel loop to lax.fori_loop / a
    # channel-tiled grid axis to bound trace size and per-step VMEM.
    for c in range(C):
        vals = {rc: ref[0, c, :, :] for rc, ref in planes.items()}
        # tap (kh, kw) == unit-stride slice of parity plane (kh%2, kw%2)
        # offset by (kh//2, kw//2)
        taps = [vals[(kh % 2, kw % 2)][kh // 2:kh // 2 + Ho, kw // 2:kw // 2 + Wo]
                for kh in range(3) for kw in range(3)]
        for o in range(O):
            base = (o * C + c) * 9
            for t in range(9):
                accs[o] = accs[o] + w_ref[base + t] * taps[t]

    for o in range(O):
        o_ref[0, o, :, :] = accs[o]


def downsampled_get_normal_forward(x_nchw, weight, bias):
    """x_nchw: (B, C, H, W); weight: (3, C, 3, 3); bias: (3,). Returns (B, 3, Ho, Wo)."""
    B, C, H, W = x_nchw.shape
    O, Cw, KH, KW = weight.shape
    assert (O, KH, KW) == (3, 3, 3) and Cw == C
    stride, pad = 2, 1
    H_out = (H + 2 * pad - KH) // stride + 1
    W_out = (W + 2 * pad - KW) // stride + 1

    # --- glue: zero-pad (extra +1 row/col only to make padded dims even) and
    #     split into 4 parity planes.  Single ~1x pass, layout stays NCHW. ---
    x_f32 = x_nchw.astype(jnp.float32)
    x_pad = jnp.pad(
        x_f32, ((0, 0), (0, 0), (pad, pad + H % 2), (pad, pad + W % 2)))
    Hh, Wh = x_pad.shape[2] // 2, x_pad.shape[3] // 2
    p_ee = x_pad[:, :, 0::2, 0::2]
    p_eo = x_pad[:, :, 0::2, 1::2]
    p_oe = x_pad[:, :, 1::2, 0::2]
    p_oo = x_pad[:, :, 1::2, 1::2]

    w_flat = weight.reshape(-1).astype(jnp.float32)        # (O*C*9,), (o,c,kh,kw)
    b_flat = bias.reshape(-1).astype(jnp.float32)          # (O,)

    plane_spec = pl.BlockSpec((1, C, Hh, Wh), lambda b: (b, 0, 0, 0))
    smem_spec = pl.BlockSpec(memory_space=pltpu.MemorySpace.SMEM)

    # TODO(synk): for very large images, add an output-row tile axis to the grid
    # (needs a 1-row halo between tiles) so the per-step VMEM block stays small.
    out = pl.pallas_call(
        _conv3x3_s2_kernel,
        out_shape=jax.ShapeDtypeStruct((B, O, H_out, W_out), jnp.float32),
        grid=(B,),
        in_specs=[smem_spec, smem_spec,
                  plane_spec, plane_spec, plane_spec, plane_spec],
        out_specs=pl.BlockSpec((1, O, H_out, W_out), lambda b: (b, 0, 0, 0)),
        compiler_params=pltpu.CompilerParams(
            dimension_semantics=("parallel",)),
    )(w_flat, b_flat, p_ee, p_eo, p_oe, p_oo)
    return out


if __name__ == "__main__":
    B, C, H, W = 2, 4, 16, 16
    key = jax.random.PRNGKey(0)
    kx, kw_, kb = jax.random.split(key, 3)

    x = jax.random.normal(kx, (B, C, H, W), dtype=jnp.float32)
    # deterministic synthetic parameters (shapes from nn.Conv2d(C, 3, 3, stride=2))
    fan_in = C * 3 * 3
    bound = 1.0 / np.sqrt(fan_in)
    weight = jax.random.uniform(kw_, (3, C, 3, 3), minval=-bound, maxval=bound,
                                dtype=jnp.float32)
    bias = jax.random.uniform(kb, (3,), minval=-bound, maxval=bound,
                              dtype=jnp.float32)

    out = jax.block_until_ready(downsampled_get_normal_forward(x, weight, bias))

    # sanity check against XLA's conv (same semantics as the PyTorch module)
    ref = jax.lax.conv_general_dilated(
        x, weight, window_strides=(2, 2), padding=[(1, 1), (1, 1)],
        dimension_numbers=("NCHW", "OIHW", "NCHW"),
    ) + bias.reshape(1, 3, 1, 1)
    np.testing.assert_allclose(np.asarray(out), np.asarray(ref), rtol=1e-5, atol=1e-5)

    print("KERNEL_OK")
</pallas_src>

<mosaic_0001>
module attributes {stable_mosaic.version = 11 : i64} {
  func.func @_conv3x3_s2_kernel(%arg0: i32, %arg1: memref<108xf32, #tpu.memory_space<smem>>, %arg2: memref<3xf32, #tpu.memory_space<smem>>, %arg3: memref<1x4x9x9xf32, #tpu.memory_space<vmem>>, %arg4: memref<1x4x9x9xf32, #tpu.memory_space<vmem>>, %arg5: memref<1x4x9x9xf32, #tpu.memory_space<vmem>>, %arg6: memref<1x4x9x9xf32, #tpu.memory_space<vmem>>, %arg7: memref<1x3x8x8xf32, #tpu.memory_space<vmem>>) attributes {dimension_semantics = [#tpu.dimension_semantics<parallel>], iteration_bounds = array<i64: 2>, scalar_prefetch = 0 : i64, scratch_operands = 0 : i64, tpu.core_type = #tpu.core_type<tc>, window_params = [{transform_indices = @transform_0, window_bounds = array<i64: 108>}, {transform_indices = @transform_1, window_bounds = array<i64: 3>}, {transform_indices = @transform_2, window_bounds = array<i64: 1, 4, 9, 9>}, {transform_indices = @transform_3, window_bounds = array<i64: 1, 4, 9, 9>}, {transform_indices = @transform_4, window_bounds = array<i64: 1, 4, 9, 9>}, {transform_indices = @transform_5, window_bounds = array<i64: 1, 4, 9, 9>}, {transform_indices = @transform_6, window_bounds = array<i64: 1, 3, 8, 8>}]} {
    %cst = arith.constant 0.000000e+00 : f32
    %0 = vector.broadcast %cst : f32 to vector<8x8xf32>
    %c0 = arith.constant 0 : index
    %1 = memref.load %arg2[%c0] : memref<3xf32, #tpu.memory_space<smem>>
    %2 = vector.broadcast %1 : f32 to vector<8x8xf32>
    %3 = arith.addf %0, %2 : vector<8x8xf32>
    %cst_0 = arith.constant 0.000000e+00 : f32
    %4 = vector.broadcast %cst_0 : f32 to vector<8x8xf32>
    %c1 = arith.constant 1 : index
    %5 = memref.load %arg2[%c1] : memref<3xf32, #tpu.memory_space<smem>>
    %6 = vector.broadcast %5 : f32 to vector<8x8xf32>
    %7 = arith.addf %4, %6 : vector<8x8xf32>
    %cst_1 = arith.constant 0.000000e+00 : f32
    %8 = vector.broadcast %cst_1 : f32 to vector<8x8xf32>
    %c2 = arith.constant 2 : index
    %9 = memref.load %arg2[%c2] : memref<3xf32, #tpu.memory_space<smem>>
    %10 = vector.broadcast %9 : f32 to vector<8x8xf32>
    %11 = arith.addf %8, %10 : vector<8x8xf32>
    %c0_2 = arith.constant 0 : index
    %c0_3 = arith.constant 0 : index
    %c0_4 = arith.constant 0 : index
    %c0_5 = arith.constant 0 : index
    %12 = vector.load %arg3[%c0_2, %c0_3, %c0_4, %c0_5] : memref<1x4x9x9xf32, #tpu.memory_space<vmem>>, vector<1x1x9x9xf32>
    %13 = vector.shape_cast %12 : vector<1x1x9x9xf32> to vector<9x9xf32>
    %c0_6 = arith.constant 0 : index
    %c0_7 = arith.constant 0 : index
    %c0_8 = arith.constant 0 : index
    %c0_9 = arith.constant 0 : index
    %14 = vector.load %arg4[%c0_6, %c0_7, %c0_8, %c0_9] : memref<1x4x9x9xf32, #tpu.memory_space<vmem>>, vector<1x1x9x9xf32>
    %15 = vector.shape_cast %14 : vector<1x1x9x9xf32> to vector<9x9xf32>
    %c0_10 = arith.constant 0 : index
    %c0_11 = arith.constant 0 : index
    %c0_12 = arith.constant 0 : index
    %c0_13 = arith.constant 0 : index
    %16 = vector.load %arg5[%c0_10, %c0_11, %c0_12, %c0_13] : memref<1x4x9x9xf32, #tpu.memory_space<vmem>>, vector<1x1x9x9xf32>
    %17 = vector.shape_cast %16 : vector<1x1x9x9xf32> to vector<9x9xf32>
    %c0_14 = arith.constant 0 : index
    %c0_15 = arith.constant 0 : index
    %c0_16 = arith.constant 0 : index
    %c0_17 = arith.constant 0 : index
    %18 = vector.load %arg6[%c0_14, %c0_15, %c0_16, %c0_17] : memref<1x4x9x9xf32, #tpu.memory_space<vmem>>, vector<1x1x9x9xf32>
    %19 = vector.shape_cast %18 : vector<1x1x9x9xf32> to vector<9x9xf32>
    %20 = vector.extract_strided_slice %13 {offsets = [0, 0], sizes = [8, 8], strides = [1, 1]} : vector<9x9xf32> to vector<8x8xf32>
    %21 = vector.extract_strided_slice %15 {offsets = [0, 0], sizes = [8, 8], strides = [1, 1]} : vector<9x9xf32> to vector<8x8xf32>
    %22 = vector.extract_strided_slice %13 {offsets = [0, 1], sizes = [8, 8], strides = [1, 1]} : vector<9x9xf32> to vector<8x8xf32>
    %23 = vector.extract_strided_slice %17 {offsets = [0, 0], sizes = [8, 8], strides = [1, 1]} : vector<9x9xf32> to vector<8x8xf32>
    %24 = vector.extract_strided_slice %19 {offsets = [0, 0], sizes = [8, 8], strides = [1, 1]} : vector<9x9xf32> to vector<8x8xf32>
    %25 = vector.extract_strided_slice %17 {offsets = [0, 1], sizes = [8, 8], strides = [1, 1]} : vector<9x9xf32> to vector<8x8xf32>
    %26 = vector.extract_strided_slice %13 {offsets = [1, 0], sizes = [8, 8], strides = [1, 1]} : vector<9x9xf32> to vector<8x8xf32>
    %27 = vector.extract_strided_slice %15 {offsets = [1, 0], sizes = [8, 8], strides = [1, 1]} : vector<9x9xf32> to vector<8x8xf32>
    %28 = vector.extract_strided_slice %13 {offsets = [1, 1], sizes = [8, 8], strides = [1, 1]} : vector<9x9xf32> to vector<8x8xf32>
    %c0_18 = arith.constant 0 : index
    %29 = memref.load %arg1[%c0_18] : memref<108xf32, #tpu.memory_space<smem>>
    %30 = vector.broadcast %29 : f32 to vector<8x8xf32>
    %31 = arith.mulf %30, %20 : vector<8x8xf32>
    %32 = arith.addf %3, %31 : vector<8x8xf32>
    %c1_19 = arith.constant 1 : index
    %33 = memref.load %arg1[%c1_19] : memref<108xf32, #tpu.memory_space<smem>>
    %34 = vector.broadcast %33 : f32 to vector<8x8xf32>
    %35 = arith.mulf %34, %21 : vector<8x8xf32>
    %36 = arith.addf %32, %35 : vector<8x8xf32>
    %c2_20 = arith.constant 2 : index
    %37 = memref.load %arg1[%c2_20] : memref<108xf32, #tpu.memory_space<smem>>
    %38 = vector.broadcast %37 : f32 to vector<8x8xf32>
    %39 = arith.mulf %38, %22 : vector<8x8xf32>
    %40 = arith.addf %36, %39 : vector<8x8xf32>
    %c3 = arith.constant 3 : index
    %41 = memref.load %arg1[%c3] : memref<108xf32, #tpu.memory_space<smem>>
    %42 = vector.broadcast %41 : f32 to vector<8x8xf32>
    %43 = arith.mulf %42, %23 : vector<8x8xf32>
    %44 = arith.addf %40, %43 : vector<8x8xf32>
    %c4 = arith.constant 4 : index
    %45 = memref.load %arg1[%c4] : memref<108xf32, #tpu.memory_space<smem>>
    %46 = vector.broadcast %45 : f32 to vector<8x8xf32>
    %47 = arith.mulf %46, %24 : vector<8x8xf32>
    %48 = arith.addf %44, %47 : vector<8x8xf32>
    %c5 = arith.constant 5 : index
    %49 = memref.load %arg1[%c5] : memref<108xf32, #tpu.memory_space<smem>>
    %50 = vector.broadcast %49 : f32 to vector<8x8xf32>
    %51 = arith.mulf %50, %25 : vector<8x8xf32>
    %52 = arith.addf %48, %51 : vector<8x8xf32>
    %c6 = arith.constant 6 : index
    %53 = memref.load %arg1[%c6] : memref<108xf32, #tpu.memory_space<smem>>
    %54 = vector.broadcast %53 : f32 to vector<8x8xf32>
    %55 = arith.mulf %54, %26 : vector<8x8xf32>
    %56 = arith.addf %52, %55 : vector<8x8xf32>
    %c7 = arith.constant 7 : index
    %57 = memref.load %arg1[%c7] : memref<108xf32, #tpu.memory_space<smem>>
    %58 = vector.broadcast %57 : f32 to vector<8x8xf32>
    %59 = arith.mulf %58, %27 : vector<8x8xf32>
    %60 = arith.addf %56, %59 : vector<8x8xf32>
    %c8 = arith.constant 8 : index
    %61 = memref.load %arg1[%c8] : memref<108xf32, #tpu.memory_space<smem>>
    %62 = vector.broadcast %61 : f32 to vector<8x8xf32>
    %63 = arith.mulf %62, %28 : vector<8x8xf32>
    %64 = arith.addf %60, %63 : vector<8x8xf32>
    %c36 = arith.constant 36 : index
    %65 = memref.load %arg1[%c36] : memref<108xf32, #tpu.memory_space<smem>>
    %66 = vector.broadcast %65 : f32 to vector<8x8xf32>
    %67 = arith.mulf %66, %20 : vector<8x8xf32>
    %68 = arith.addf %7, %67 : vector<8x8xf32>
    %c37 = arith.constant 37 : index
    %69 = memref.load %arg1[%c37] : memref<108xf32, #tpu.memory_space<smem>>
    %70 = vector.broadcast %69 : f32 to vector<8x8xf32>
    %71 = arith.mulf %70, %21 : vector<8x8xf32>
    %72 = arith.addf %68, %71 : vector<8x8xf32>
    %c38 = arith.constant 38 : index
    %73 = memref.load %arg1[%c38] : memref<108xf32, #tpu.memory_space<smem>>
    %74 = vector.broadcast %73 : f32 to vector<8x8xf32>
    %75 = arith.mulf %74, %22 : vector<8x8xf32>
    %76 = arith.addf %72, %75 : vector<8x8xf32>
    %c39 = arith.constant 39 : index
    %77 = memref.load %arg1[%c39] : memref<108xf32, #tpu.memory_space<smem>>
    %78 = vector.broadcast %77 : f32 to vector<8x8xf32>
    %79 = arith.mulf %78, %23 : vector<8x8xf32>
    %80 = arith.addf %76, %79 : vector<8x8xf32>
    %c40 = arith.constant 40 : index
    %81 = memref.load %arg1[%c40] : memref<108xf32, #tpu.memory_space<smem>>
    %82 = vector.broadcast %81 : f32 to vector<8x8xf32>
    %83 = arith.mulf %82, %24 : vector<8x8xf32>
    %84 = arith.addf %80, %83 : vector<8x8xf32>
    %c41 = arith.constant 41 : index
    %85 = memref.load %arg1[%c41] : memref<108xf32, #tpu.memory_space<smem>>
    %86 = vector.broadcast %85 : f32 to vector<8x8xf32>
    %87 = arith.mulf %86, %25 : vector<8x8xf32>
    %88 = arith.addf %84, %87 : vector<8x8xf32>
    %c42 = arith.constant 42 : index
    %89 = memref.load %arg1[%c42] : memref<108xf32, #tpu.memory_space<smem>>
    %90 = vector.broadcast %89 : f32 to vector<8x8xf32>
    %91 = arith.mulf %90, %26 : vector<8x8xf32>
    %92 = arith.addf %88, %91 : vector<8x8xf32>
    %c43 = arith.constant 43 : index
    %93 = memref.load %arg1[%c43] : memref<108xf32, #tpu.memory_space<smem>>
    %94 = vector.broadcast %93 : f32 to vector<8x8xf32>
    %95 = arith.mulf %94, %27 : vector<8x8xf32>
    %96 = arith.addf %92, %95 : vector<8x8xf32>
    %c44 = arith.constant 44 : index
    %97 = memref.load %arg1[%c44] : memref<108xf32, #tpu.memory_space<smem>>
    %98 = vector.broadcast %97 : f32 to vector<8x8xf32>
    %99 = arith.mulf %98, %28 : vector<8x8xf32>
    %100 = arith.addf %96, %99 : vector<8x8xf32>
    %c72 = arith.constant 72 : index
    %101 = memref.load %arg1[%c72] : memref<108xf32, #tpu.memory_space<smem>>
    %102 = vector.broadcast %101 : f32 to vector<8x8xf32>
    %103 = arith.mulf %102, %20 : vector<8x8xf32>
    %104 = arith.addf %11, %103 : vector<8x8xf32>
    %c73 = arith.constant 73 : index
    %105 = memref.load %arg1[%c73] : memref<108xf32, #tpu.memory_space<smem>>
    %106 = vector.broadcast %105 : f32 to vector<8x8xf32>
    %107 = arith.mulf %106, %21 : vector<8x8xf32>
    %108 = arith.addf %104, %107 : vector<8x8xf32>
    %c74 = arith.constant 74 : index
    %109 = memref.load %arg1[%c74] : memref<108xf32, #tpu.memory_space<smem>>
    %110 = vector.broadcast %109 : f32 to vector<8x8xf32>
    %111 = arith.mulf %110, %22 : vector<8x8xf32>
    %112 = arith.addf %108, %111 : vector<8x8xf32>
    %c75 = arith.constant 75 : index
    %113 = memref.load %arg1[%c75] : memref<108xf32, #tpu.memory_space<smem>>
    %114 = vector.broadcast %113 : f32 to vector<8x8xf32>
    %115 = arith.mulf %114, %23 : vector<8x8xf32>
    %116 = arith.addf %112, %115 : vector<8x8xf32>
    %c76 = arith.constant 76 : index
    %117 = memref.load %arg1[%c76] : memref<108xf32, #tpu.memory_space<smem>>
    %118 = vector.broadcast %117 : f32 to vector<8x8xf32>
    %119 = arith.mulf %118, %24 : vector<8x8xf32>
    %120 = arith.addf %116, %119 : vector<8x8xf32>
    %c77 = arith.constant 77 : index
    %121 = memref.load %arg1[%c77] : memref<108xf32, #tpu.memory_space<smem>>
    %122 = vector.broadcast %121 : f32 to vector<8x8xf32>
    %123 = arith.mulf %122, %25 : vector<8x8xf32>
    %124 = arith.addf %120, %123 : vector<8x8xf32>
    %c78 = arith.constant 78 : index
    %125 = memref.load %arg1[%c78] : memref<108xf32, #tpu.memory_space<smem>>
    %126 = vector.broadcast %125 : f32 to vector<8x8xf32>
    %127 = arith.mulf %126, %26 : vector<8x8xf32>
    %128 = arith.addf %124, %127 : vector<8x8xf32>
    %c79 = arith.constant 79 : index
    %129 = memref.load %arg1[%c79] : memref<108xf32, #tpu.memory_space<smem>>
    %130 = vector.broadcast %129 : f32 to vector<8x8xf32>
    %131 = arith.mulf %130, %27 : vector<8x8xf32>
    %132 = arith.addf %128, %131 : vector<8x8xf32>
    %c80 = arith.constant 80 : index
    %133 = memref.load %arg1[%c80] : memref<108xf32, #tpu.memory_space<smem>>
    %134 = vector.broadcast %133 : f32 to vector<8x8xf32>
    %135 = arith.mulf %134, %28 : vector<8x8xf32>
    %136 = arith.addf %132, %135 : vector<8x8xf32>
    %c0_21 = arith.constant 0 : index
    %c1_22 = arith.constant 1 : index
    %c0_23 = arith.constant 0 : index
    %c0_24 = arith.constant 0 : index
    %137 = vector.load %arg3[%c0_21, %c1_22, %c0_23, %c0_24] : memref<1x4x9x9xf32, #tpu.memory_space<vmem>>, vector<1x1x9x9xf32>
    %138 = vector.shape_cast %137 : vector<1x1x9x9xf32> to vector<9x9xf32>
    %c0_25 = arith.constant 0 : index
    %c1_26 = arith.constant 1 : index
    %c0_27 = arith.constant 0 : index
    %c0_28 = arith.constant 0 : index
    %139 = vector.load %arg4[%c0_25, %c1_26, %c0_27, %c0_28] : memref<1x4x9x9xf32, #tpu.memory_space<vmem>>, vector<1x1x9x9xf32>
    %140 = vector.shape_cast %139 : vector<1x1x9x9xf32> to vector<9x9xf32>
    %c0_29 = arith.constant 0 : index
    %c1_30 = arith.constant 1 : index
    %c0_31 = arith.constant 0 : index
    %c0_32 = arith.constant 0 : index
    %141 = vector.load %arg5[%c0_29, %c1_30, %c0_31, %c0_32] : memref<1x4x9x9xf32, #tpu.memory_space<vmem>>, vector<1x1x9x9xf32>
    %142 = vector.shape_cast %141 : vector<1x1x9x9xf32> to vector<9x9xf32>
    %c0_33 = arith.constant 0 : index
    %c1_34 = arith.constant 1 : index
    %c0_35 = arith.constant 0 : index
    %c0_36 = arith.constant 0 : index
    %143 = vector.load %arg6[%c0_33, %c1_34, %c0_35, %c0_36] : memref<1x4x9x9xf32, #tpu.memory_space<vmem>>, vector<1x1x9x9xf32>
    %144 = vector.shape_cast %143 : vector<1x1x9x9xf32> to vector<9x9xf32>
    %145 = vector.extract_strided_slice %138 {offsets = [0, 0], sizes = [8, 8], strides = [1, 1]} : vector<9x9xf32> to vector<8x8xf32>
    %146 = vector.extract_strided_slice %140 {offsets = [0, 0], sizes = [8, 8], strides = [1, 1]} : vector<9x9xf32> to vector<8x8xf32>
    %147 = vector.extract_strided_slice %138 {offsets = [0, 1], sizes = [8, 8], strides = [1, 1]} : vector<9x9xf32> to vector<8x8xf32>
    %148 = vector.extract_strided_slice %142 {offsets = [0, 0], sizes = [8, 8], strides = [1, 1]} : vector<9x9xf32> to vector<8x8xf32>
    %149 = vector.extract_strided_slice %144 {offsets = [0, 0], sizes = [8, 8], strides = [1, 1]} : vector<9x9xf32> to vector<8x8xf32>
    %150 = vector.extract_strided_slice %142 {offsets = [0, 1], sizes = [8, 8], strides = [1, 1]} : vector<9x9xf32> to vector<8x8xf32>
    %151 = vector.extract_strided_slice %138 {offsets = [1, 0], sizes = [8, 8], strides = [1, 1]} : vector<9x9xf32> to vector<8x8xf32>
    %152 = vector.extract_strided_slice %140 {offsets = [1, 0], sizes = [8, 8], strides = [1, 1]} : vector<9x9xf32> to vector<8x8xf32>
    %153 = vector.extract_strided_slice %138 {offsets = [1, 1], sizes = [8, 8], strides = [1, 1]} : vector<9x9xf32> to vector<8x8xf32>
    %c9 = arith.constant 9 : index
    %154 = memref.load %arg1[%c9] : memref<108xf32, #tpu.memory_space<smem>>
    %155 = vector.broadcast %154 : f32 to vector<8x8xf32>
    %156 = arith.mulf %155, %145 : vector<8x8xf32>
    %157 = arith.addf %64, %156 : vector<8x8xf32>
    %c10 = arith.constant 10 : index
    %158 = memref.load %arg1[%c10] : memref<108xf32, #tpu.memory_space<smem>>
    %159 = vector.broadcast %158 : f32 to vector<8x8xf32>
    %160 = arith.mulf %159, %146 : vector<8x8xf32>
    %161 = arith.addf %157, %160 : vector<8x8xf32>
    %c11 = arith.constant 11 : index
    %162 = memref.load %arg1[%c11] : memref<108xf32, #tpu.memory_space<smem>>
    %163 = vector.broadcast %162 : f32 to vector<8x8xf32>
    %164 = arith.mulf %163, %147 : vector<8x8xf32>
    %165 = arith.addf %161, %164 : vector<8x8xf32>
    %c12 = arith.constant 12 : index
    %166 = memref.load %arg1[%c12] : memref<108xf32, #tpu.memory_space<smem>>
    %167 = vector.broadcast %166 : f32 to vector<8x8xf32>
    %168 = arith.mulf %167, %148 : vector<8x8xf32>
    %169 = arith.addf %165, %168 : vector<8x8xf32>
    %c13 = arith.constant 13 : index
    %170 = memref.load %arg1[%c13] : memref<108xf32, #tpu.memory_space<smem>>
    %171 = vector.broadcast %170 : f32 to vector<8x8xf32>
    %172 = arith.mulf %171, %149 : vector<8x8xf32>
    %173 = arith.addf %169, %172 : vector<8x8xf32>
    %c14 = arith.constant 14 : index
    %174 = memref.load %arg1[%c14] : memref<108xf32, #tpu.memory_space<smem>>
    %175 = vector.broadcast %174 : f32 to vector<8x8xf32>
    %176 = arith.mulf %175, %150 : vector<8x8xf32>
    %177 = arith.addf %173, %176 : vector<8x8xf32>
    %c15 = arith.constant 15 : index
    %178 = memref.load %arg1[%c15] : memref<108xf32, #tpu.memory_space<smem>>
    %179 = vector.broadcast %178 : f32 to vector<8x8xf32>
    %180 = arith.mulf %179, %151 : vector<8x8xf32>
    %181 = arith.addf %177, %180 : vector<8x8xf32>
    %c16 = arith.constant 16 : index
    %182 = memref.load %arg1[%c16] : memref<108xf32, #tpu.memory_space<smem>>
    %183 = vector.broadcast %182 : f32 to vector<8x8xf32>
    %184 = arith.mulf %183, %152 : vector<8x8xf32>
    %185 = arith.addf %181, %184 : vector<8x8xf32>
    %c17 = arith.constant 17 : index
    %186 = memref.load %arg1[%c17] : memref<108xf32, #tpu.memory_space<smem>>
    %187 = vector.broadcast %186 : f32 to vector<8x8xf32>
    %188 = arith.mulf %187, %153 : vector<8x8xf32>
    %189 = arith.addf %185, %188 : vector<8x8xf32>
    %c45 = arith.constant 45 : index
    %190 = memref.load %arg1[%c45] : memref<108xf32, #tpu.memory_space<smem>>
    %191 = vector.broadcast %190 : f32 to vector<8x8xf32>
    %192 = arith.mulf %191, %145 : vector<8x8xf32>
    %193 = arith.addf %100, %192 : vector<8x8xf32>
    %c46 = arith.constant 46 : index
    %194 = memref.load %arg1[%c46] : memref<108xf32, #tpu.memory_space<smem>>
    %195 = vector.broadcast %194 : f32 to vector<8x8xf32>
    %196 = arith.mulf %195, %146 : vector<8x8xf32>
    %197 = arith.addf %193, %196 : vector<8x8xf32>
    %c47 = arith.constant 47 : index
    %198 = memref.load %arg1[%c47] : memref<108xf32, #tpu.memory_space<smem>>
    %199 = vector.broadcast %198 : f32 to vector<8x8xf32>
    %200 = arith.mulf %199, %147 : vector<8x8xf32>
    %201 = arith.addf %197, %200 : vector<8x8xf32>
    %c48 = arith.constant 48 : index
    %202 = memref.load %arg1[%c48] : memref<108xf32, #tpu.memory_space<smem>>
    %203 = vector.broadcast %202 : f32 to vector<8x8xf32>
    %204 = arith.mulf %203, %148 : vector<8x8xf32>
    %205 = arith.addf %201, %204 : vector<8x8xf32>
    %c49 = arith.constant 49 : index
    %206 = memref.load %arg1[%c49] : memref<108xf32, #tpu.memory_space<smem>>
    %207 = vector.broadcast %206 : f32 to vector<8x8xf32>
    %208 = arith.mulf %207, %149 : vector<8x8xf32>
    %209 = arith.addf %205, %208 : vector<8x8xf32>
    %c50 = arith.constant 50 : index
    %210 = memref.load %arg1[%c50] : memref<108xf32, #tpu.memory_space<smem>>
    %211 = vector.broadcast %210 : f32 to vector<8x8xf32>
    %212 = arith.mulf %211, %150 : vector<8x8xf32>
    %213 = arith.addf %209, %212 : vector<8x8xf32>
    %c51 = arith.constant 51 : index
    %214 = memref.load %arg1[%c51] : memref<108xf32, #tpu.memory_space<smem>>
    %215 = vector.broadcast %214 : f32 to vector<8x8xf32>
    %216 = arith.mulf %215, %151 : vector<8x8xf32>
    %217 = arith.addf %213, %216 : vector<8x8xf32>
    %c52 = arith.constant 52 : index
    %218 = memref.load %arg1[%c52] : memref<108xf32, #tpu.memory_space<smem>>
    %219 = vector.broadcast %218 : f32 to vector<8x8xf32>
    %220 = arith.mulf %219, %152 : vector<8x8xf32>
    %221 = arith.addf %217, %220 : vector<8x8xf32>
    %c53 = arith.constant 53 : index
    %222 = memref.load %arg1[%c53] : memref<108xf32, #tpu.memory_space<smem>>
    %223 = vector.broadcast %222 : f32 to vector<8x8xf32>
    %224 = arith.mulf %223, %153 : vector<8x8xf32>
    %225 = arith.addf %221, %224 : vector<8x8xf32>
    %c81 = arith.constant 81 : index
    %226 = memref.load %arg1[%c81] : memref<108xf32, #tpu.memory_space<smem>>
    %227 = vector.broadcast %226 : f32 to vector<8x8xf32>
    %228 = arith.mulf %227, %145 : vector<8x8xf32>
    %229 = arith.addf %136, %228 : vector<8x8xf32>
    %c82 = arith.constant 82 : index
    %230 = memref.load %arg1[%c82] : memref<108xf32, #tpu.memory_space<smem>>
    %231 = vector.broadcast %230 : f32 to vector<8x8xf32>
    %232 = arith.mulf %231, %146 : vector<8x8xf32>
    %233 = arith.addf %229, %232 : vector<8x8xf32>
    %c83 = arith.constant 83 : index
    %234 = memref.load %arg1[%c83] : memref<108xf32, #tpu.memory_space<smem>>
    %235 = vector.broadcast %234 : f32 to vector<8x8xf32>
    %236 = arith.mulf %235, %147 : vector<8x8xf32>
    %237 = arith.addf %233, %236 : vector<8x8xf32>
    %c84 = arith.constant 84 : index
    %238 = memref.load %arg1[%c84] : memref<108xf32, #tpu.memory_space<smem>>
    %239 = vector.broadcast %238 : f32 to vector<8x8xf32>
    %240 = arith.mulf %239, %148 : vector<8x8xf32>
    %241 = arith.addf %237, %240 : vector<8x8xf32>
    %c85 = arith.constant 85 : index
    %242 = memref.load %arg1[%c85] : memref<108xf32, #tpu.memory_space<smem>>
    %243 = vector.broadcast %242 : f32 to vector<8x8xf32>
    %244 = arith.mulf %243, %149 : vector<8x8xf32>
    %245 = arith.addf %241, %244 : vector<8x8xf32>
    %c86 = arith.constant 86 : index
    %246 = memref.load %arg1[%c86] : memref<108xf32, #tpu.memory_space<smem>>
    %247 = vector.broadcast %246 : f32 to vector<8x8xf32>
    %248 = arith.mulf %247, %150 : vector<8x8xf32>
    %249 = arith.addf %245, %248 : vector<8x8xf32>
    %c87 = arith.constant 87 : index
    %250 = memref.load %arg1[%c87] : memref<108xf32, #tpu.memory_space<smem>>
    %251 = vector.broadcast %250 : f32 to vector<8x8xf32>
    %252 = arith.mulf %251, %151 : vector<8x8xf32>
    %253 = arith.addf %249, %252 : vector<8x8xf32>
    %c88 = arith.constant 88 : index
    %254 = memref.load %arg1[%c88] : memref<108xf32, #tpu.memory_space<smem>>
    %255 = vector.broadcast %254 : f32 to vector<8x8xf32>
    %256 = arith.mulf %255, %152 : vector<8x8xf32>
    %257 = arith.addf %253, %256 : vector<8x8xf32>
    %c89 = arith.constant 89 : index
    %258 = memref.load %arg1[%c89] : memref<108xf32, #tpu.memory_space<smem>>
    %259 = vector.broadcast %258 : f32 to vector<8x8xf32>
    %260 = arith.mulf %259, %153 : vector<8x8xf32>
    %261 = arith.addf %257, %260 : vector<8x8xf32>
    %c0_37 = arith.constant 0 : index
    %c2_38 = arith.constant 2 : index
    %c0_39 = arith.constant 0 : index
    %c0_40 = arith.constant 0 : index
    %262 = vector.load %arg3[%c0_37, %c2_38, %c0_39, %c0_40] : memref<1x4x9x9xf32, #tpu.memory_space<vmem>>, vector<1x1x9x9xf32>
    %263 = vector.shape_cast %262 : vector<1x1x9x9xf32> to vector<9x9xf32>
    %c0_41 = arith.constant 0 : index
    %c2_42 = arith.constant 2 : index
    %c0_43 = arith.constant 0 : index
    %c0_44 = arith.constant 0 : index
    %264 = vector.load %arg4[%c0_41, %c2_42, %c0_43, %c0_44] : memref<1x4x9x9xf32, #tpu.memory_space<vmem>>, vector<1x1x9x9xf32>
    %265 = vector.shape_cast %264 : vector<1x1x9x9xf32> to vector<9x9xf32>
    %c0_45 = arith.constant 0 : index
    %c2_46 = arith.constant 2 : index
    %c0_47 = arith.constant 0 : index
    %c0_48 = arith.constant 0 : index
    %266 = vector.load %arg5[%c0_45, %c2_46, %c0_47, %c0_48] : memref<1x4x9x9xf32, #tpu.memory_space<vmem>>, vector<1x1x9x9xf32>
    %267 = vector.shape_cast %266 : vector<1x1x9x9xf32> to vector<9x9xf32>
    %c0_49 = arith.constant 0 : index
    %c2_50 = arith.constant 2 : index
    %c0_51 = arith.constant 0 : index
    %c0_52 = arith.constant 0 : index
    %268 = vector.load %arg6[%c0_49, %c2_50, %c0_51, %c0_52] : memref<1x4x9x9xf32, #tpu.memory_space<vmem>>, vector<1x1x9x9xf32>
    %269 = vector.shape_cast %268 : vector<1x1x9x9xf32> to vector<9x9xf32>
    %270 = vector.extract_strided_slice %263 {offsets = [0, 0], sizes = [8, 8], strides = [1, 1]} : vector<9x9xf32> to vector<8x8xf32>
    %271 = vector.extract_strided_slice %265 {offsets = [0, 0], sizes = [8, 8], strides = [1, 1]} : vector<9x9xf32> to vector<8x8xf32>
    %272 = vector.extract_strided_slice %263 {offsets = [0, 1], sizes = [8, 8], strides = [1, 1]} : vector<9x9xf32> to vector<8x8xf32>
    %273 = vector.extract_strided_slice %267 {offsets = [0, 0], sizes = [8, 8], strides = [1, 1]} : vector<9x9xf32> to vector<8x8xf32>
    %274 = vector.extract_strided_slice %269 {offsets = [0, 0], sizes = [8, 8], strides = [1, 1]} : vector<9x9xf32> to vector<8x8xf32>
    %275 = vector.extract_strided_slice %267 {offsets = [0, 1], sizes = [8, 8], strides = [1, 1]} : vector<9x9xf32> to vector<8x8xf32>
    %276 = vector.extract_strided_slice %263 {offsets = [1, 0], sizes = [8, 8], strides = [1, 1]} : vector<9x9xf32> to vector<8x8xf32>
    %277 = vector.extract_strided_slice %265 {offsets = [1, 0], sizes = [8, 8], strides = [1, 1]} : vector<9x9xf32> to vector<8x8xf32>
    %278 = vector.extract_strided_slice %263 {offsets = [1, 1], sizes = [8, 8], strides = [1, 1]} : vector<9x9xf32> to vector<8x8xf32>
    %c18 = arith.constant 18 : index
    %279 = memref.load %arg1[%c18] : memref<108xf32, #tpu.memory_space<smem>>
    %280 = vector.broadcast %279 : f32 to vector<8x8xf32>
    %281 = arith.mulf %280, %270 : vector<8x8xf32>
    %282 = arith.addf %189, %281 : vector<8x8xf32>
    %c19 = arith.constant 19 : index
    %283 = memref.load %arg1[%c19] : memref<108xf32, #tpu.memory_space<smem>>
    %284 = vector.broadcast %283 : f32 to vector<8x8xf32>
    %285 = arith.mulf %284, %271 : vector<8x8xf32>
    %286 = arith.addf %282, %285 : vector<8x8xf32>
    %c20 = arith.constant 20 : index
    %287 = memref.load %arg1[%c20] : memref<108xf32, #tpu.memory_space<smem>>
    %288 = vector.broadcast %287 : f32 to vector<8x8xf32>
    %289 = arith.mulf %288, %272 : vector<8x8xf32>
    %290 = arith.addf %286, %289 : vector<8x8xf32>
    %c21 = arith.constant 21 : index
    %291 = memref.load %arg1[%c21] : memref<108xf32, #tpu.memory_space<smem>>
    %292 = vector.broadcast %291 : f32 to vector<8x8xf32>
    %293 = arith.mulf %292, %273 : vector<8x8xf32>
    %294 = arith.addf %290, %293 : vector<8x8xf32>
    %c22 = arith.constant 22 : index
    %295 = memref.load %arg1[%c22] : memref<108xf32, #tpu.memory_space<smem>>
    %296 = vector.broadcast %295 : f32 to vector<8x8xf32>
    %297 = arith.mulf %296, %274 : vector<8x8xf32>
    %298 = arith.addf %294, %297 : vector<8x8xf32>
    %c23 = arith.constant 23 : index
    %299 = memref.load %arg1[%c23] : memref<108xf32, #tpu.memory_space<smem>>
    %300 = vector.broadcast %299 : f32 to vector<8x8xf32>
    %301 = arith.mulf %300, %275 : vector<8x8xf32>
    %302 = arith.addf %298, %301 : vector<8x8xf32>
    %c24 = arith.constant 24 : index
    %303 = memref.load %arg1[%c24] : memref<108xf32, #tpu.memory_space<smem>>
    %304 = vector.broadcast %303 : f32 to vector<8x8xf32>
    %305 = arith.mulf %304, %276 : vector<8x8xf32>
    %306 = arith.addf %302, %305 : vector<8x8xf32>
    %c25 = arith.constant 25 : index
    %307 = memref.load %arg1[%c25] : memref<108xf32, #tpu.memory_space<smem>>
    %308 = vector.broadcast %307 : f32 to vector<8x8xf32>
    %309 = arith.mulf %308, %277 : vector<8x8xf32>
    %310 = arith.addf %306, %309 : vector<8x8xf32>
    %c26 = arith.constant 26 : index
    %311 = memref.load %arg1[%c26] : memref<108xf32, #tpu.memory_space<smem>>
    %312 = vector.broadcast %311 : f32 to vector<8x8xf32>
    %313 = arith.mulf %312, %278 : vector<8x8xf32>
    %314 = arith.addf %310, %313 : vector<8x8xf32>
    %c54 = arith.constant 54 : index
    %315 = memref.load %arg1[%c54] : memref<108xf32, #tpu.memory_space<smem>>
    %316 = vector.broadcast %315 : f32 to vector<8x8xf32>
    %317 = arith.mulf %316, %270 : vector<8x8xf32>
    %318 = arith.addf %225, %317 : vector<8x8xf32>
    %c55 = arith.constant 55 : index
    %319 = memref.load %arg1[%c55] : memref<108xf32, #tpu.memory_space<smem>>
    %320 = vector.broadcast %319 : f32 to vector<8x8xf32>
    %321 = arith.mulf %320, %271 : vector<8x8xf32>
    %322 = arith.addf %318, %321 : vector<8x8xf32>
    %c56 = arith.constant 56 : index
    %323 = memref.load %arg1[%c56] : memref<108xf32, #tpu.memory_space<smem>>
    %324 = vector.broadcast %323 : f32 to vector<8x8xf32>
    %325 = arith.mulf %324, %272 : vector<8x8xf32>
    %326 = arith.addf %322, %325 : vector<8x8xf32>
    %c57 = arith.constant 57 : index
    %327 = memref.load %arg1[%c57] : memref<108xf32, #tpu.memory_space<smem>>
    %328 = vector.broadcast %327 : f32 to vector<8x8xf32>
    %329 = arith.mulf %328, %273 : vector<8x8xf32>
    %330 = arith.addf %326, %329 : vector<8x8xf32>
    %c58 = arith.constant 58 : index
    %331 = memref.load %arg1[%c58] : memref<108xf32, #tpu.memory_space<smem>>
    %332 = vector.broadcast %331 : f32 to vector<8x8xf32>
    %333 = arith.mulf %332, %274 : vector<8x8xf32>
    %334 = arith.addf %330, %333 : vector<8x8xf32>
    %c59 = arith.constant 59 : index
    %335 = memref.load %arg1[%c59] : memref<108xf32, #tpu.memory_space<smem>>
    %336 = vector.broadcast %335 : f32 to vector<8x8xf32>
    %337 = arith.mulf %336, %275 : vector<8x8xf32>
    %338 = arith.addf %334, %337 : vector<8x8xf32>
    %c60 = arith.constant 60 : index
    %339 = memref.load %arg1[%c60] : memref<108xf32, #tpu.memory_space<smem>>
    %340 = vector.broadcast %339 : f32 to vector<8x8xf32>
    %341 = arith.mulf %340, %276 : vector<8x8xf32>
    %342 = arith.addf %338, %341 : vector<8x8xf32>
    %c61 = arith.constant 61 : index
    %343 = memref.load %arg1[%c61] : memref<108xf32, #tpu.memory_space<smem>>
    %344 = vector.broadcast %343 : f32 to vector<8x8xf32>
    %345 = arith.mulf %344, %277 : vector<8x8xf32>
    %346 = arith.addf %342, %345 : vector<8x8xf32>
    %c62 = arith.constant 62 : index
    %347 = memref.load %arg1[%c62] : memref<108xf32, #tpu.memory_space<smem>>
    %348 = vector.broadcast %347 : f32 to vector<8x8xf32>
    %349 = arith.mulf %348, %278 : vector<8x8xf32>
    %350 = arith.addf %346, %349 : vector<8x8xf32>
    %c90 = arith.constant 90 : index
    %351 = memref.load %arg1[%c90] : memref<108xf32, #tpu.memory_space<smem>>
    %352 = vector.broadcast %351 : f32 to vector<8x8xf32>
    %353 = arith.mulf %352, %270 : vector<8x8xf32>
    %354 = arith.addf %261, %353 : vector<8x8xf32>
    %c91 = arith.constant 91 : index
    %355 = memref.load %arg1[%c91] : memref<108xf32, #tpu.memory_space<smem>>
    %356 = vector.broadcast %355 : f32 to vector<8x8xf32>
    %357 = arith.mulf %356, %271 : vector<8x8xf32>
    %358 = arith.addf %354, %357 : vector<8x8xf32>
    %c92 = arith.constant 92 : index
    %359 = memref.load %arg1[%c92] : memref<108xf32, #tpu.memory_space<smem>>
    %360 = vector.broadcast %359 : f32 to vector<8x8xf32>
    %361 = arith.mulf %360, %272 : vector<8x8xf32>
    %362 = arith.addf %358, %361 : vector<8x8xf32>
    %c93 = arith.constant 93 : index
    %363 = memref.load %arg1[%c93] : memref<108xf32, #tpu.memory_space<smem>>
    %364 = vector.broadcast %363 : f32 to vector<8x8xf32>
    %365 = arith.mulf %364, %273 : vector<8x8xf32>
    %366 = arith.addf %362, %365 : vector<8x8xf32>
    %c94 = arith.constant 94 : index
    %367 = memref.load %arg1[%c94] : memref<108xf32, #tpu.memory_space<smem>>
    %368 = vector.broadcast %367 : f32 to vector<8x8xf32>
    %369 = arith.mulf %368, %274 : vector<8x8xf32>
    %370 = arith.addf %366, %369 : vector<8x8xf32>
    %c95 = arith.constant 95 : index
    %371 = memref.load %arg1[%c95] : memref<108xf32, #tpu.memory_space<smem>>
    %372 = vector.broadcast %371 : f32 to vector<8x8xf32>
    %373 = arith.mulf %372, %275 : vector<8x8xf32>
    %374 = arith.addf %370, %373 : vector<8x8xf32>
    %c96 = arith.constant 96 : index
    %375 = memref.load %arg1[%c96] : memref<108xf32, #tpu.memory_space<smem>>
    %376 = vector.broadcast %375 : f32 to vector<8x8xf32>
    %377 = arith.mulf %376, %276 : vector<8x8xf32>
    %378 = arith.addf %374, %377 : vector<8x8xf32>
    %c97 = arith.constant 97 : index
    %379 = memref.load %arg1[%c97] : memref<108xf32, #tpu.memory_space<smem>>
    %380 = vector.broadcast %379 : f32 to vector<8x8xf32>
    %381 = arith.mulf %380, %277 : vector<8x8xf32>
    %382 = arith.addf %378, %381 : vector<8x8xf32>
    %c98 = arith.constant 98 : index
    %383 = memref.load %arg1[%c98] : memref<108xf32, #tpu.memory_space<smem>>
    %384 = vector.broadcast %383 : f32 to vector<8x8xf32>
    %385 = arith.mulf %384, %278 : vector<8x8xf32>
    %386 = arith.addf %382, %385 : vector<8x8xf32>
    %c0_53 = arith.constant 0 : index
    %c3_54 = arith.constant 3 : index
    %c0_55 = arith.constant 0 : index
    %c0_56 = arith.constant 0 : index
    %387 = vector.load %arg3[%c0_53, %c3_54, %c0_55, %c0_56] : memref<1x4x9x9xf32, #tpu.memory_space<vmem>>, vector<1x1x9x9xf32>
    %388 = vector.shape_cast %387 : vector<1x1x9x9xf32> to vector<9x9xf32>
    %c0_57 = arith.constant 0 : index
    %c3_58 = arith.constant 3 : index
    %c0_59 = arith.constant 0 : index
    %c0_60 = arith.constant 0 : index
    %389 = vector.load %arg4[%c0_57, %c3_58, %c0_59, %c0_60] : memref<1x4x9x9xf32, #tpu.memory_space<vmem>>, vector<1x1x9x9xf32>
    %390 = vector.shape_cast %389 : vector<1x1x9x9xf32> to vector<9x9xf32>
    %c0_61 = arith.constant 0 : index
    %c3_62 = arith.constant 3 : index
    %c0_63 = arith.constant 0 : index
    %c0_64 = arith.constant 0 : index
    %391 = vector.load %arg5[%c0_61, %c3_62, %c0_63, %c0_64] : memref<1x4x9x9xf32, #tpu.memory_space<vmem>>, vector<1x1x9x9xf32>
    %392 = vector.shape_cast %391 : vector<1x1x9x9xf32> to vector<9x9xf32>
    %c0_65 = arith.constant 0 : index
    %c3_66 = arith.constant 3 : index
    %c0_67 = arith.constant 0 : index
    %c0_68 = arith.constant 0 : index
    %393 = vector.load %arg6[%c0_65, %c3_66, %c0_67, %c0_68] : memref<1x4x9x9xf32, #tpu.memory_space<vmem>>, vector<1x1x9x9xf32>
    %394 = vector.shape_cast %393 : vector<1x1x9x9xf32> to vector<9x9xf32>
    %395 = vector.extract_strided_slice %388 {offsets = [0, 0], sizes = [8, 8], strides = [1, 1]} : vector<9x9xf32> to vector<8x8xf32>
    %396 = vector.extract_strided_slice %390 {offsets = [0, 0], sizes = [8, 8], strides = [1, 1]} : vector<9x9xf32> to vector<8x8xf32>
    %397 = vector.extract_strided_slice %388 {offsets = [0, 1], sizes = [8, 8], strides = [1, 1]} : vector<9x9xf32> to vector<8x8xf32>
    %398 = vector.extract_strided_slice %392 {offsets = [0, 0], sizes = [8, 8], strides = [1, 1]} : vector<9x9xf32> to vector<8x8xf32>
    %399 = vector.extract_strided_slice %394 {offsets = [0, 0], sizes = [8, 8], strides = [1, 1]} : vector<9x9xf32> to vector<8x8xf32>
    %400 = vector.extract_strided_slice %392 {offsets = [0, 1], sizes = [8, 8], strides = [1, 1]} : vector<9x9xf32> to vector<8x8xf32>
    %401 = vector.extract_strided_slice %388 {offsets = [1, 0], sizes = [8, 8], strides = [1, 1]} : vector<9x9xf32> to vector<8x8xf32>
    %402 = vector.extract_strided_slice %390 {offsets = [1, 0], sizes = [8, 8], strides = [1, 1]} : vector<9x9xf32> to vector<8x8xf32>
    %403 = vector.extract_strided_slice %388 {offsets = [1, 1], sizes = [8, 8], strides = [1, 1]} : vector<9x9xf32> to vector<8x8xf32>
    %c27 = arith.constant 27 : index
    %404 = memref.load %arg1[%c27] : memref<108xf32, #tpu.memory_space<smem>>
    %405 = vector.broadcast %404 : f32 to vector<8x8xf32>
    %406 = arith.mulf %405, %395 : vector<8x8xf32>
    %407 = arith.addf %314, %406 : vector<8x8xf32>
    %c28 = arith.constant 28 : index
    %408 = memref.load %arg1[%c28] : memref<108xf32, #tpu.memory_space<smem>>
    %409 = vector.broadcast %408 : f32 to vector<8x8xf32>
    %410 = arith.mulf %409, %396 : vector<8x8xf32>
    %411 = arith.addf %407, %410 : vector<8x8xf32>
    %c29 = arith.constant 29 : index
    %412 = memref.load %arg1[%c29] : memref<108xf32, #tpu.memory_space<smem>>
    %413 = vector.broadcast %412 : f32 to vector<8x8xf32>
    %414 = arith.mulf %413, %397 : vector<8x8xf32>
    %415 = arith.addf %411, %414 : vector<8x8xf32>
    %c30 = arith.constant 30 : index
    %416 = memref.load %arg1[%c30] : memref<108xf32, #tpu.memory_space<smem>>
    %417 = vector.broadcast %416 : f32 to vector<8x8xf32>
    %418 = arith.mulf %417, %398 : vector<8x8xf32>
    %419 = arith.addf %415, %418 : vector<8x8xf32>
    %c31 = arith.constant 31 : index
    %420 = memref.load %arg1[%c31] : memref<108xf32, #tpu.memory_space<smem>>
    %421 = vector.broadcast %420 : f32 to vector<8x8xf32>
    %422 = arith.mulf %421, %399 : vector<8x8xf32>
    %423 = arith.addf %419, %422 : vector<8x8xf32>
    %c32 = arith.constant 32 : index
    %424 = memref.load %arg1[%c32] : memref<108xf32, #tpu.memory_space<smem>>
    %425 = vector.broadcast %424 : f32 to vector<8x8xf32>
    %426 = arith.mulf %425, %400 : vector<8x8xf32>
    %427 = arith.addf %423, %426 : vector<8x8xf32>
    %c33 = arith.constant 33 : index
    %428 = memref.load %arg1[%c33] : memref<108xf32, #tpu.memory_space<smem>>
    %429 = vector.broadcast %428 : f32 to vector<8x8xf32>
    %430 = arith.mulf %429, %401 : vector<8x8xf32>
    %431 = arith.addf %427, %430 : vector<8x8xf32>
    %c34 = arith.constant 34 : index
    %432 = memref.load %arg1[%c34] : memref<108xf32, #tpu.memory_space<smem>>
    %433 = vector.broadcast %432 : f32 to vector<8x8xf32>
    %434 = arith.mulf %433, %402 : vector<8x8xf32>
    %435 = arith.addf %431, %434 : vector<8x8xf32>
    %c35 = arith.constant 35 : index
    %436 = memref.load %arg1[%c35] : memref<108xf32, #tpu.memory_space<smem>>
    %437 = vector.broadcast %436 : f32 to vector<8x8xf32>
    %438 = arith.mulf %437, %403 : vector<8x8xf32>
    %439 = arith.addf %435, %438 : vector<8x8xf32>
    %c63 = arith.constant 63 : index
    %440 = memref.load %arg1[%c63] : memref<108xf32, #tpu.memory_space<smem>>
    %441 = vector.broadcast %440 : f32 to vector<8x8xf32>
    %442 = arith.mulf %441, %395 : vector<8x8xf32>
    %443 = arith.addf %350, %442 : vector<8x8xf32>
    %c64 = arith.constant 64 : index
    %444 = memref.load %arg1[%c64] : memref<108xf32, #tpu.memory_space<smem>>
    %445 = vector.broadcast %444 : f32 to vector<8x8xf32>
    %446 = arith.mulf %445, %396 : vector<8x8xf32>
    %447 = arith.addf %443, %446 : vector<8x8xf32>
    %c65 = arith.constant 65 : index
    %448 = memref.load %arg1[%c65] : memref<108xf32, #tpu.memory_space<smem>>
    %449 = vector.broadcast %448 : f32 to vector<8x8xf32>
    %450 = arith.mulf %449, %397 : vector<8x8xf32>
    %451 = arith.addf %447, %450 : vector<8x8xf32>
    %c66 = arith.constant 66 : index
    %452 = memref.load %arg1[%c66] : memref<108xf32, #tpu.memory_space<smem>>
    %453 = vector.broadcast %452 : f32 to vector<8x8xf32>
    %454 = arith.mulf %453, %398 : vector<8x8xf32>
    %455 = arith.addf %451, %454 : vector<8x8xf32>
    %c67 = arith.constant 67 : index
    %456 = memref.load %arg1[%c67] : memref<108xf32, #tpu.memory_space<smem>>
    %457 = vector.broadcast %456 : f32 to vector<8x8xf32>
    %458 = arith.mulf %457, %399 : vector<8x8xf32>
    %459 = arith.addf %455, %458 : vector<8x8xf32>
    %c68 = arith.constant 68 : index
    %460 = memref.load %arg1[%c68] : memref<108xf32, #tpu.memory_space<smem>>
    %461 = vector.broadcast %460 : f32 to vector<8x8xf32>
    %462 = arith.mulf %461, %400 : vector<8x8xf32>
    %463 = arith.addf %459, %462 : vector<8x8xf32>
    %c69 = arith.constant 69 : index
    %464 = memref.load %arg1[%c69] : memref<108xf32, #tpu.memory_space<smem>>
    %465 = vector.broadcast %464 : f32 to vector<8x8xf32>
    %466 = arith.mulf %465, %401 : vector<8x8xf32>
    %467 = arith.addf %463, %466 : vector<8x8xf32>
    %c70 = arith.constant 70 : index
    %468 = memref.load %arg1[%c70] : memref<108xf32, #tpu.memory_space<smem>>
    %469 = vector.broadcast %468 : f32 to vector<8x8xf32>
    %470 = arith.mulf %469, %402 : vector<8x8xf32>
    %471 = arith.addf %467, %470 : vector<8x8xf32>
    %c71 = arith.constant 71 : index
    %472 = memref.load %arg1[%c71] : memref<108xf32, #tpu.memory_space<smem>>
    %473 = vector.broadcast %472 : f32 to vector<8x8xf32>
    %474 = arith.mulf %473, %403 : vector<8x8xf32>
    %475 = arith.addf %471, %474 : vector<8x8xf32>
    %c99 = arith.constant 99 : index
    %476 = memref.load %arg1[%c99] : memref<108xf32, #tpu.memory_space<smem>>
    %477 = vector.broadcast %476 : f32 to vector<8x8xf32>
    %478 = arith.mulf %477, %395 : vector<8x8xf32>
    %479 = arith.addf %386, %478 : vector<8x8xf32>
    %c100 = arith.constant 100 : index
    %480 = memref.load %arg1[%c100] : memref<108xf32, #tpu.memory_space<smem>>
    %481 = vector.broadcast %480 : f32 to vector<8x8xf32>
    %482 = arith.mulf %481, %396 : vector<8x8xf32>
    %483 = arith.addf %479, %482 : vector<8x8xf32>
    %c101 = arith.constant 101 : index
    %484 = memref.load %arg1[%c101] : memref<108xf32, #tpu.memory_space<smem>>
    %485 = vector.broadcast %484 : f32 to vector<8x8xf32>
    %486 = arith.mulf %485, %397 : vector<8x8xf32>
    %487 = arith.addf %483, %486 : vector<8x8xf32>
    %c102 = arith.constant 102 : index
    %488 = memref.load %arg1[%c102] : memref<108xf32, #tpu.memory_space<smem>>
    %489 = vector.broadcast %488 : f32 to vector<8x8xf32>
    %490 = arith.mulf %489, %398 : vector<8x8xf32>
    %491 = arith.addf %487, %490 : vector<8x8xf32>
    %c103 = arith.constant 103 : index
    %492 = memref.load %arg1[%c103] : memref<108xf32, #tpu.memory_space<smem>>
    %493 = vector.broadcast %492 : f32 to vector<8x8xf32>
    %494 = arith.mulf %493, %399 : vector<8x8xf32>
    %495 = arith.addf %491, %494 : vector<8x8xf32>
    %c104 = arith.constant 104 : index
    %496 = memref.load %arg1[%c104] : memref<108xf32, #tpu.memory_space<smem>>
    %497 = vector.broadcast %496 : f32 to vector<8x8xf32>
    %498 = arith.mulf %497, %400 : vector<8x8xf32>
    %499 = arith.addf %495, %498 : vector<8x8xf32>
    %c105 = arith.constant 105 : index
    %500 = memref.load %arg1[%c105] : memref<108xf32, #tpu.memory_space<smem>>
    %501 = vector.broadcast %500 : f32 to vector<8x8xf32>
    %502 = arith.mulf %501, %401 : vector<8x8xf32>
    %503 = arith.addf %499, %502 : vector<8x8xf32>
    %c106 = arith.constant 106 : index
    %504 = memref.load %arg1[%c106] : memref<108xf32, #tpu.memory_space<smem>>
    %505 = vector.broadcast %504 : f32 to vector<8x8xf32>
    %506 = arith.mulf %505, %402 : vector<8x8xf32>
    %507 = arith.addf %503, %506 : vector<8x8xf32>
    %c107 = arith.constant 107 : index
    %508 = memref.load %arg1[%c107] : memref<108xf32, #tpu.memory_space<smem>>
    %509 = vector.broadcast %508 : f32 to vector<8x8xf32>
    %510 = arith.mulf %509, %403 : vector<8x8xf32>
    %511 = arith.addf %507, %510 : vector<8x8xf32>
    %c0_69 = arith.constant 0 : index
    %c0_70 = arith.constant 0 : index
    %c0_71 = arith.constant 0 : index
    %c0_72 = arith.constant 0 : index
    %512 = vector.load %arg7[%c0_69, %c0_70, %c0_71, %c0_72] : memref<1x3x8x8xf32, #tpu.memory_space<vmem>>, vector<1x1x8x8xf32>
    %513 = vector.shape_cast %512 : vector<1x1x8x8xf32> to vector<8x8xf32>
    %514 = vector.shape_cast %439 : vector<8x8xf32> to vector<1x1x8x8xf32>
    tpu.vector_store %arg7[%c0_69, %c0_70, %c0_71, %c0_72], %514 {strides = array<i32>} : memref<1x3x8x8xf32, #tpu.memory_space<vmem>>, vector<1x1x8x8xf32>,
    %c0_73 = arith.constant 0 : index
    %c1_74 = arith.constant 1 : index
    %c0_75 = arith.constant 0 : index
    %c0_76 = arith.constant 0 : index
    %515 = vector.load %arg7[%c0_73, %c1_74, %c0_75, %c0_76] : memref<1x3x8x8xf32, #tpu.memory_space<vmem>>, vector<1x1x8x8xf32>
    %516 = vector.shape_cast %515 : vector<1x1x8x8xf32> to vector<8x8xf32>
    %517 = vector.shape_cast %475 : vector<8x8xf32> to vector<1x1x8x8xf32>
    tpu.vector_store %arg7[%c0_73, %c1_74, %c0_75, %c0_76], %517 {strides = array<i32>} : memref<1x3x8x8xf32, #tpu.memory_space<vmem>>, vector<1x1x8x8xf32>,
    %c0_77 = arith.constant 0 : index
    %c2_78 = arith.constant 2 : index
    %c0_79 = arith.constant 0 : index
    %c0_80 = arith.constant 0 : index
    %518 = vector.load %arg7[%c0_77, %c2_78, %c0_79, %c0_80] : memref<1x3x8x8xf32, #tpu.memory_space<vmem>>, vector<1x1x8x8xf32>
    %519 = vector.shape_cast %518 : vector<1x1x8x8xf32> to vector<8x8xf32>
    %520 = vector.shape_cast %511 : vector<8x8xf32> to vector<1x1x8x8xf32>
    tpu.vector_store %arg7[%c0_77, %c2_78, %c0_79, %c0_80], %520 {strides = array<i32>} : memref<1x3x8x8xf32, #tpu.memory_space<vmem>>, vector<1x1x8x8xf32>,
    return
  }
  func.func @transform_0(%arg0: i32) -> i32 {
    %c0_i32 = arith.constant 0 : i32
    %c0_i32_0 = arith.constant 0 : i32
    return %c0_i32 : i32
  }
  func.func @transform_1(%arg0: i32) -> i32 {
    %c0_i32 = arith.constant 0 : i32
    %c0_i32_0 = arith.constant 0 : i32
    return %c0_i32 : i32
  }
  func.func @transform_2(%arg0: i32) -> (i32, i32, i32, i32) {
    %c0_i32 = arith.constant 0 : i32
    %c0_i32_0 = arith.constant 0 : i32
    %c0_i32_1 = arith.constant 0 : i32
    %c0_i32_2 = arith.constant 0 : i32
    return %arg0, %c0_i32, %c0_i32_0, %c0_i32_1 : i32, i32, i32, i32
  }
  func.func @transform_3(%arg0: i32) -> (i32, i32, i32, i32) {
    %c0_i32 = arith.constant 0 : i32
    %c0_i32_0 = arith.constant 0 : i32
    %c0_i32_1 = arith.constant 0 : i32
    %c0_i32_2 = arith.constant 0 : i32
    return %arg0, %c0_i32, %c0_i32_0, %c0_i32_1 : i32, i32, i32, i32
  }
  func.func @transform_4(%arg0: i32) -> (i32, i32, i32, i32) {
    %c0_i32 = arith.constant 0 : i32
    %c0_i32_0 = arith.constant 0 : i32
    %c0_i32_1 = arith.constant 0 : i32
    %c0_i32_2 = arith.constant 0 : i32
    return %arg0, %c0_i32, %c0_i32_0, %c0_i32_1 : i32, i32, i32, i32
  }
  func.func @transform_5(%arg0: i32) -> (i32, i32, i32, i32) {
    %c0_i32 = arith.constant 0 : i32
    %c0_i32_0 = arith.constant 0 : i32
    %c0_i32_1 = arith.constant 0 : i32
    %c0_i32_2 = arith.constant 0 : i32
    return %arg0, %c0_i32, %c0_i32_0, %c0_i32_1 : i32, i32, i32, i32
  }
  func.func @transform_6(%arg0: i32) -> (i32, i32, i32, i32) {
    %c0_i32 = arith.constant 0 : i32
    %c0_i32_0 = arith.constant 0 : i32
    %c0_i32_1 = arith.constant 0 : i32
    %c0_i32_2 = arith.constant 0 : i32
    return %arg0, %c0_i32, %c0_i32_0, %c0_i32_1 : i32, i32, i32, i32
  }
}

</mosaic_0001>

<bundles_post_ra>
// kernel: tpu_custom_call.1
= control target key start
LH: loop header
LB: loop body
LE: loop exit
PB: predicated region body
PF: predicated region fallthrough
CT: control target
= control target key end

     0   :  { %s2352_s0 = inlined_call_operand.vmem [shape: f32[108], index: 0, kind: input, shape index: {}]   ;;  %s2353_s1 = inlined_call_operand.vmem [shape: f32[3], index: 1, kind: input, shape index: {}]   ;;  %s2354_s2 = inlined_call_operand.vmem [shape: f32[2,4,9,9], index: 2, kind: input, shape index: {}]   ;;  %s2355_s3 = inlined_call_operand.vmem [shape: f32[2,4,9,9], index: 3, kind: input, shape index: {}]   ;;  %s2356_s4 = inlined_call_operand.vmem [shape: f32[2,4,9,9], index: 4, kind: input, shape index: {}]   ;;  %s2357_s5 = inlined_call_operand.vmem [shape: f32[2,4,9,9], index: 5, kind: input, shape index: {}]   ;;  %s2358_s6 = inlined_call_operand.hbm [shape: f32[2,3,8,8], index: 6, kind: output, shape index: {}]  }
   0x1   :  { %2362 = sst [smem:[#allocation14_spill]] %s2352_s0 }
   0x2   :  { %2363 = sst [smem:[#allocation15_spill]] %s2353_s1 }
   0x3   :  { %2364 = sst [smem:[#allocation16_spill]] %s2354_s2 }
   0x4   :  { %2365 = sst [smem:[#allocation17_spill]] %s2356_s4 }
   0x5   :  { %11 = vsyncpa [#allocation4], 0 }
   0x6   :  { %12 = vsyncpa [#allocation6], 0 }
   0x7   :  { %13 = vsyncpa [#allocation3], 0 }
   0x8   :  { %15 = vsyncpa [#allocation3 + $0x1], 0  ;;  %s1688_s21 = smov 0   ;;  %s1690_s22 = smov 0  }
   0x9   :  { %s1692_s23 = smov 0   ;;  %s1694_s24 = smov 0  }
   0xa LB: > { %2366 = sst [smem:[#allocation11_spill]] %s1642_s23  ;;  %s1709_s25 = sadd.s32 4294967295, %s1646_s24   ;;  %s1646_s24 = sphi %s1694_s24, %s2375_s24   ;;  %s1642_s23 = sphi %s1692_s23, %s2377_s23   ;;  %s1638_s22 = sphi %s1690_s22, %s2379_s22   ;;  %s1634_s21 = sphi %s1688_s21, %s2378_s21  }
   0xb   : > { %s1329_s26 = sadd.s32 4294967294, %s1646_s24   ;;  %s1713_s27 = sadd.s32 1, %s1646_s24  }
   0xc   : > { %2367 = sst [smem:[#allocation12_spill]] %s1713_s27  ;;  %s174_s28 = sadd.s32 1, %s1642_s23 }
   0xd   : > { %s171_s29 = ssub.s32 %s1646_s24, %s1713_s27  ;;  %p184_p0 = scmp.ne.s32.totalorder %s1642_s23, %s1638_s22 }
   0xe   : > { %p172_p1 = scmp.eq.s32.totalorder %s171_s29, 0  ;;  %p185_p2 = scmp.eq.s32.totalorder %s1709_s25, 1 }
   0xf   : > { %p190_p3 = scmp.ne.s32.totalorder %s1638_s22, %s1634_s21  ;;  %p191_p4 = scmp.eq.s32.totalorder %s1329_s26, 1 }
  0x10   : > { %s1724_s30 = scalar_select %p172_p1, %s1642_s23, %s174_s28  }
  0x11   : > { %p1726_p5 = por %p185_p2, %p184_p0  ;;  %p1730_p6 = por %p191_p4, %p190_p3 }
  0x12   : > { %2368 = sst [smem:[#allocation13_spill]] %s1724_s30  ;;  %p1330_p7 = scmp.ge.s32.totalorder %s1646_s24, 1 }
  0x13   : > { %p198_p8 = scmp.lt.s32.totalorder %s1646_s24, 3  ;;  %p1504_p9 = scmp.eq.s32.totalorder %s1709_s25, 0 }
  0x14   : > { %s2371_s0 = sld [smem:[#allocation14_spill]]  ;;  %s1648_s15 = smov [#allocation2]  }
  0x15   : > { %p199_p10 = pnand %p1330_p7, %p198_p8  ;;  %s2372_s1 = sld [smem:[#allocation15_spill]] }
  0x16   : > { %s1649_s16 = smov [#allocation5]  }
  0x17   : > { %p1493_p11 = pneg %p199_p10 }
  0x19   : > { %p1494_p12 = pnand %p1504_p9, %p1493_p11  ;;  %265 = sbr.rel (%p199_p10) target bundleno = 259 (0x103), region = 44 }
  0x1a   : > { %s210_s11 = sshll.u32 %s2371_s0, 4  ;;  %s211_s11 = int_to_ptr.vmem [resolvable:$true] %s210_s11 }
  0x1b   : > { %s220_s14 = sshll.u32 %s2372_s1, 4  ;;  %s221_s14 = int_to_ptr.vmem [resolvable:$true] %s220_s14 }
  0x1c   : > { %1496 = dma.vmem_to_smem (!%p1494_p12), %s211_s11, 16, %s1648_s15, [#allocation4]  }
  0x1d   : > { %1499 = dma.vmem_to_smem (!%p1494_p12), %s221_s14, 16, %s1649_s16, [#allocation6]  }
  0x1e   : > { %1621 = dma.done.wait (%p1504_p9), [#allocation4], 16  }
  0x1f   : > { %1623 = vsyncadd (%p1504_p9), [#allocation4], 4294967280 }
  0x20   : > { %1625 = dma.done.wait (%p1504_p9), [#allocation6], 16  }
  0x21   : > { %1627 = vsyncadd (%p1504_p9), [#allocation6], 4294967280 }
  0x22   : > { %277 = sfence }
  0x23   : > { %p317_p13 = scmp.lt.s32.totalorder %s1709_s25, 1  ;;  %s1366_s17 = sld [smem:[#allocation2 + $0x4a]]  ;;  %vm390_vm0 = vcmask 1046528   ;;  %vm1187_vm1 = vcmask 64512  }
  0x24   : > { %s1348_s19 = sld [smem:[#allocation2 + $0x2]] }
  0x25   : > { %s318_s18 = scalar_select %p317_p13, %s1709_s25, 1 }
  0x26   : > { %s1360_s26 = sld [smem:[#allocation2 + $0x29]] }
  0x27   : > { %s1755_s20 = sshll.u32 %s318_s18, 6  ;;  %s2373_s2 = sld [smem:[#allocation16_spill]] }
  0x28   : > { %s2374_s4 = sld [smem:[#allocation17_spill]]  ;;  %s1650_s18 = smov 127  }
  0x29   : > { %s1351_s13 = sld [smem:[#allocation2 + $0x5]]  ;;  %v496_v1 = vstv %s1366_s17 }
  0x2a   : > { %s1357_s14 = sld [smem:[#allocation2 + $0x26]]  ;;  %v361_v4 = vstv %s1348_s19 }
  0x2b   : > { %s1369_s15 = sld [smem:[#allocation2 + $0x4d]] }
  0x2c   : > { %s1363_s16 = sld [smem:[#allocation2 + $0x2c]]  ;;  %v445_v6 = vstv %s1360_s26 }
  0x2d   : > { %s1761_s9 = scalar_lea.vmem %s2373_s2, %s1755_s20  ;;  %s1354_s28 = sld [smem:[#allocation2 + $0x8]] }
  0x2e   : > { %s1767_s12 = scalar_lea.vmem %s2374_s4, %s1755_s20  ;;  %v1770_v0 = vld [vmem:[%s1761_s9] sm:$0xff]  ;;  %s1372_s29 = sld [smem:[#allocation2 + $0x50]]  ;;  %v1782_v10 = vld [vmem:[%s1761_s9 + $0x8] sm:$0x1]  ;;  %v1801_v33 = vld [vmem:[%s1761_s9 + $0x10] sm:$0xff] }
  0x2f   : > { %v497_v2 = vmul.f32 %v496_v1, %v1770_v0  ;;  %v1774_v3 = vld [vmem:[%s1767_s12] sm:$0xff]  ;;  %v362_v5 = vmul.f32 %v361_v4, %v1770_v0  ;;  %v377_v8 = vstv %s1351_s13  ;;  %s1390_s17 = sld [smem:[#allocation2 + $0x2f]]  ;;  %v1810_v40 = vld [vmem:[%s1767_s12 + $0x10] sm:$0xff]  ;;  %v1814_v42 = vld [vmem:[%s1761_s9 + $0x18] sm:$0x1]  ;;  %s1933_s4 = scalar_lea.vmem %s2355_s3, %s1755_s20 }
  0x30   : > { %v446_v7 = vmul.f32 %v445_v6, %v1774_v3  ;;  %v429_v9 = vstv %s1357_s14  ;;  %v378_v11 = vmul.f32 %v377_v8, %v1774_v3  ;;  %s1381_s19 = sld [smem:[#allocation2 + $0xb]]  ;;  %v1834_v4 = vld [vmem:[%s1761_s9 + $0x20] sm:$0xff]  ;;  %s1947_s2 = scalar_lea.vmem %s2357_s5, %s1755_s20 }
  0x31   : > { %499 = vrot.lane.b32.xlu1 %v497_v2, %s1650_s18  ;;  %364 = vrot.lane.b32.xlu0 %v362_v5, %s1650_s18  ;;  %v512_v12 = vstv %s1369_s15  ;;  %v430_v14 = vmul.f32 %v429_v9, %v1770_v0  ;;  %s1399_s26 = sld [smem:[#allocation2 + $0x53]] }
  0x32   : > { %448 = vrot.lane.b32.xlu2 %v446_v7, %s1650_s18  ;;  %v475_v13 = vstv %s1363_s16  ;;  %v513_v18 = vmul.f32 %v512_v12, %v1774_v3  ;;  %s1393_s10 = sld [smem:[#allocation2 + $0x32]]  ;;  %v1843_v12 = vld [vmem:[%s1767_s12 + $0x20] sm:$0xff] }
  0x33   : > { %v476_v15 = vmul.f32 %v475_v13, %v1770_v0  ;;  %v477_v16 = vmul.f32 %v475_v13, %v1782_v10  ;;  %v408_v17 = vstv %s1354_s28  ;;  %s1384_s11 = sld [smem:[#allocation2 + $0xe]] }
  0x34   : > { %v409_v19 = vmul.f32 %v408_v17, %v1770_v0  ;;  %v410_v20 = vmul.f32 %v408_v17, %v1782_v10  ;;  %v542_v21 = vstv %s1372_s29  ;;  %s1396_s13 = sld [smem:[#allocation2 + $0x35]] }
  0x35   : > { %v543_v22 = vmul.f32 %v542_v21, %v1770_v0  ;;  %v544_v23 = vmul.f32 %v542_v21, %v1782_v10  ;;  %v480_v24 = vrot.slane %v476_v15, 1  ;;  %v481_v25 = vrot.slane %v477_v16, 1  ;;  %s1402_s14 = sld [smem:[#allocation2 + $0x56]] }
  0x36   : > { %v413_v26 = vrot.slane %v409_v19, 1  ;;  %v414_v27 = vrot.slane %v410_v20, 1  ;;  %v640_v34 = vstv %s1390_s17  ;;  %v573_v35 = vstv %s1381_s19  ;;  %s1387_s15 = sld [smem:[#allocation2 + $0x11]] }
  0x37   : > { %v547_v28 = vrot.slane %v543_v22, 1  ;;  %v548_v29 = vrot.slane %v544_v23, 1  ;;  %v482_v30 = vsel %vm390_vm0, %v480_v24, %v481_v25  ;;  %v641_v36 = vmul.f32 %v1801_v33, %v640_v34  ;;  %s1405_s16 = sld [smem:[#allocation2 + $0x59]] }
  0x38   : > { %v415_v31 = vsel %vm390_vm0, %v413_v26, %v414_v27  ;;  %v707_v37 = vstv %s1399_s26  ;;  %v574_v38 = vmul.f32 %v1801_v33, %v573_v35  ;;  %v656_v41 = vstv %s1393_s10  ;;  %s1423_s28 = sld [smem:[#allocation2 + $0x38]] }
  0x39   : > { %380 = vrot.lane.b32.xlu1 %v378_v11, %s1650_s18  ;;  %432 = vrot.lane.b32.xlu0 %v430_v14, %s1650_s18  ;;  %v549_v32 = vsel %vm390_vm0, %v547_v28, %v548_v29  ;;  %v708_v39 = vmul.f32 %v1801_v33, %v707_v37  ;;  %v589_v44 = vstv %s1384_s11  ;;  %v657_v45 = vmul.f32 %v1810_v40, %v656_v41  ;;  %s1414_s29 = sld [smem:[#allocation2 + $0x14]]  ;;  %v1847_v14 = vld [vmem:[%s1761_s9 + $0x28] sm:$0x1] }
  0x3a   : > { %515 = vrot.lane.b32.xlu2 %v513_v18, %s1650_s18  ;;  %v686_v43 = vstv %s1396_s13  ;;  %v590_v51 = vmul.f32 %v1810_v40, %v589_v44  ;;  %s1432_s17 = sld [smem:[#allocation2 + $0x5c]] }
  0x3b   : > { %v723_v46 = vstv %s1402_s14  ;;  %v687_v48 = vmul.f32 %v1801_v33, %v686_v43  ;;  %v688_v49 = vmul.f32 %v1814_v42, %v686_v43  ;;  %s1426_s19 = sld [smem:[#allocation2 + $0x3b]] }
  0x3c   : > { %v619_v47 = vstv %s1387_s15  ;;  %v724_v52 = vmul.f32 %v1810_v40, %v723_v46  ;;  %s1417_s26 = sld [smem:[#allocation2 + $0x17]] }
  0x3d   : > { %v753_v50 = vstv %s1405_s16  ;;  %v620_v53 = vmul.f32 %v1801_v33, %v619_v47  ;;  %v621_v54 = vmul.f32 %v1814_v42, %v619_v47  ;;  %v691_v57 = vrot.slane %v687_v48, 1  ;;  %s1429_s10 = sld [smem:[#allocation2 + $0x3e]]  ;;  %v1876_v48 = vld [vmem:[%s1767_s12 + $0x30] sm:$0xff] }
  0x3e   : > { %v754_v55 = vmul.f32 %v1801_v33, %v753_v50  ;;  %v755_v56 = vmul.f32 %v1814_v42, %v753_v50  ;;  %v692_v58 = vrot.slane %v688_v49, 1  ;;  %v851_v5 = vstv %s1423_s28  ;;  %s1435_s11 = sld [smem:[#allocation2 + $0x5f]]  ;;  %v1880_v50 = vld [vmem:[%s1761_s9 + $0x38] sm:$0x1] }
  0x3f   : > { %v624_v59 = vrot.slane %v620_v53, 1  ;;  %v625_v60 = vrot.slane %v621_v54, 1  ;;  %v784_v6 = vstv %s1414_s29  ;;  %v852_v7 = vmul.f32 %v1834_v4, %v851_v5  ;;  %s1420_s13 = sld [smem:[#allocation2 + $0x1a]] }
  0x40   : > { %v758_v61 = vrot.slane %v754_v55, 1  ;;  %v759_v62 = vrot.slane %v755_v56, 1  ;;  %v693_v63 = vsel %vm390_vm0, %v691_v57, %v692_v58  ;;  %v918_v8 = vstv %s1432_s17  ;;  %s1438_s14 = sld [smem:[#allocation2 + $0x62]] }
  0x41   : > { %483 = vrot.lane.b32.xlu1 %v482_v30, %s1650_s18  ;;  %416 = vrot.lane.b32.xlu0 %v415_v31, %s1650_s18  ;;  %v626_v1 = vsel %vm390_vm0, %v624_v59, %v625_v60  ;;  %v785_v9 = vmul.f32 %v1834_v4, %v784_v6  ;;  %v919_v11 = vmul.f32 %v1834_v4, %v918_v8  ;;  %v867_v13 = vstv %s1426_s19  ;;  %s1456_s15 = sld [smem:[#allocation2 + $0x41]] }
  0x42   : > { %550 = vrot.lane.b32.xlu2 %v549_v32, %s1650_s18  ;;  %v760_v2 = vsel %vm390_vm0, %v758_v61, %v759_v62  ;;  %v800_v16 = vstv %s1417_s26  ;;  %v868_v17 = vmul.f32 %v1843_v12, %v867_v13  ;;  %s1447_s16 = sld [smem:[#allocation2 + $0x1d]] }
  0x43   : > { %v897_v15 = vstv %s1429_s10  ;;  %v801_v23 = vmul.f32 %v1843_v12, %v800_v16  ;;  %s1465_s28 = sld [smem:[#allocation2 + $0x65]] }
  0x44   : > { %v934_v18 = vstv %s1435_s11  ;;  %v898_v20 = vmul.f32 %v1834_v4, %v897_v15  ;;  %v899_v21 = vmul.f32 %v1847_v14, %v897_v15  ;;  %s1459_s29 = sld [smem:[#allocation2 + $0x44]] }
  0x45   : > { %v830_v19 = vstv %s1420_s13  ;;  %v935_v24 = vmul.f32 %v1843_v12, %v934_v18  ;;  %s1450_s17 = sld [smem:[#allocation2 + $0x20]] }
  0x46   : > { %v964_v22 = vstv %s1438_s14  ;;  %v831_v25 = vmul.f32 %v1834_v4, %v830_v19  ;;  %v832_v26 = vmul.f32 %v1847_v14, %v830_v19  ;;  %v902_v29 = vrot.slane %v898_v20, 1  ;;  %s1462_s19 = sld [smem:[#allocation2 + $0x47]] }
  0x47   : > { %v965_v27 = vmul.f32 %v1834_v4, %v964_v22  ;;  %v966_v28 = vmul.f32 %v1847_v14, %v964_v22  ;;  %v903_v30 = vrot.slane %v899_v21, 1  ;;  %v1062_v41 = vstv %s1456_s15  ;;  %s1468_s26 = sld [smem:[#allocation2 + $0x68]] }
  0x48   : > { %v835_v31 = vrot.slane %v831_v25, 1  ;;  %v836_v32 = vrot.slane %v832_v26, 1  ;;  %v995_v43 = vstv %s1447_s16  ;;  %s1453_s10 = sld [smem:[#allocation2 + $0x23]] }
  0x49   : > { %643 = vrot.lane.b32.xlu1 %v641_v36, %s1650_s18  ;;  %576 = vrot.lane.b32.xlu0 %v574_v38, %s1650_s18  ;;  %v969_v34 = vrot.slane %v965_v27, 1  ;;  %v970_v35 = vrot.slane %v966_v28, 1  ;;  %v904_v36 = vsel %vm390_vm0, %v902_v29, %v903_v30  ;;  %s1471_s11 = sld [smem:[#allocation2 + $0x6b]] }
  0x4a   : > { %710 = vrot.lane.b32.xlu2 %v708_v39, %s1650_s18  ;;  %v837_v37 = vsel %vm390_vm0, %v835_v31, %v836_v32  ;;  %v1867_v39 = vld [vmem:[%s1761_s9 + $0x30] sm:$0xff]  ;;  %v1078_v49 = vstv %s1459_s29  ;;  %s1896_s9 = sld [smem:[#allocation5 + $0x2]] }
  0x4b   : > { %v971_v38 = vsel %vm390_vm0, %v969_v34, %v970_v35  ;;  %v1063_v44 = vmul.f32 %v1867_v39, %v1062_v41  ;;  %v996_v46 = vmul.f32 %v1867_v39, %v995_v43  ;;  %v1079_v53 = vmul.f32 %v1876_v48, %v1078_v49  ;;  %s1364_s12 = sld [smem:[#allocation2 + $0x48]]  ;;  %v1966_v34 = vld [vmem:[%s1947_s2] sm:$0xff] }
  0x4c   : > { %s1901_s13 = sld [smem:[#allocation2 + $0x49]] }
  0x4d   : > { %v1145_v54 = vstv %s1468_s26  ;;  %s1903_s14 = sld [smem:[#allocation2 + $0x4b]] }
  0x4e   : > { %v1041_v55 = vstv %s1453_s10  ;;  %v1146_v60 = vmul.f32 %v1876_v48, %v1145_v54  ;;  %s1906_s15 = sld [smem:[#allocation2 + $0x4c]] }
  0x4f   : > { %v1175_v58 = vstv %s1471_s11  ;;  %v1042_v61 = vmul.f32 %v1867_v39, %v1041_v55  ;;  %v1043_v62 = vmul.f32 %v1880_v50, %v1041_v55  ;;  %s1370_s16 = sld [smem:[#allocation2 + $0x4e]] }
  0x50   : > { %s352_s29 = sld [smem:[#allocation2]]  ;;  %v344_v21 = vstv %s1896_s9 }
  0x51   : > { %659 = vrot.lane.b32.xlu1 %v657_v45, %s1650_s18  ;;  %592 = vrot.lane.b32.xlu0 %v590_v51, %s1650_s18  ;;  %v1129_v45 = vstv %s1465_s28  ;;  %v1108_v51 = vstv %s1462_s19  ;;  %v1046_v6 = vrot.slane %v1042_v61, 1  ;;  %s1909_s28 = sld [smem:[#allocation5]] }
  0x52   : > { %726 = vrot.lane.b32.xlu2 %v724_v52, %s1650_s18  ;;  %v1130_v47 = vmul.f32 %v1867_v39, %v1129_v45  ;;  %v1011_v52 = vstv %s1450_s17  ;;  %v1109_v56 = vmul.f32 %v1867_v39, %v1108_v51  ;;  %v1110_v57 = vmul.f32 %v1880_v50, %v1108_v51  ;;  %s1913_s17 = sld [smem:[#allocation2 + $0x1]] }
  0x53   : > { %v1012_v59 = vmul.f32 %v1876_v48, %v1011_v52  ;;  %s1915_s19 = sld [smem:[#allocation2 + $0x3]]  ;;  %v504_v29 = vstv %s1903_s14 }
  0x54   : > { %v1114_v5 = vrot.slane %v1110_v57, 1  ;;  %s1917_s26 = sld [smem:[#allocation2 + $0x24]]  ;;  %v508_v30 = vstv %s1906_s15  ;;  %v505_v49 = vmul.f32 %v504_v29, %v1774_v3 }
  0x55   : > { %s1919_s10 = sld [smem:[#allocation2 + $0x4f]]  ;;  %v520_v19 = vstv %s1370_s16  ;;  %v509_v54 = vmul.f32 %v508_v30, %v1966_v34 }
  0x56   : > { %s1921_s11 = sld [smem:[#allocation2 + $0x51]]  ;;  %v353_v20 = vstv %s352_s29  ;;  %v521_v25 = vmul.f32 %v520_v19, %v1770_v0  ;;  %v522_v26 = vmul.f32 %v520_v19, %v1782_v10 }
  0x57   : > { %s1925_s0 = sld [smem:[#allocation2 + $0x25]]  ;;  %v354_v28 = vmul.f32 %v353_v20, %v1770_v0  ;;  %v338_v31 = vstv %s1909_s28 }
  0x58   : > { %s1935_s30 = sld [smem:[#allocation2 + $0x52]]  ;;  %v357_v32 = vstv %s1913_s17  ;;  %v525_v43 = vrot.slane %v521_v25, 1 }
  0x59   : > { %694 = vrot.lane.b32.xlu1 %v693_v63, %s1650_s18  ;;  %627 = vrot.lane.b32.xlu0 %v626_v1, %s1650_s18  ;;  %v1176_v63 = vmul.f32 %v1867_v39, %v1175_v58  ;;  %v1177_v1 = vmul.f32 %v1880_v50, %v1175_v58  ;;  %s1937_s23 = sld [smem:[#allocation2 + $0x4]]  ;;  %v369_v52 = vstv %s1915_s19 }
  0x5a   : > { %761 = vrot.lane.b32.xlu2 %v760_v2, %s1650_s18  ;;  %v1113_v2 = vrot.slane %v1109_v56, 1  ;;  %v421_v27 = vstv %s1917_s26  ;;  %s1956_s9 = sld [smem:[#allocation2 + $0x2a]] }
  0x5b   : > { %v1180_v8 = vrot.slane %v1176_v63, 1  ;;  %s1959_s27 = sld [smem:[#allocation2 + $0x7]]  ;;  %v422_v41 = vmul.f32 %v421_v27, %v1770_v0  ;;  %v370_v63 = vmul.f32 %v369_v52, %v1774_v3 }
  0x5c   : > { %s1976_s20 = sld [smem:[#allocation2 + $0x2b]] }
  0x5d   : > { %s1993_s14 = sld [smem:[#allocation2 + $0x28]] }
  0x5e   : > { %s2009_s15 = sld [smem:[#allocation2 + $0x55]] }
  0x5f   : > { %v373_v57 = vstv %s1937_s23  ;;  %s2003_s23 = sld [smem:[#allocation2 + $0x57]] }
  0x60   : > { %s2021_s16 = sld [smem:[#allocation2 + $0x2d]] }
  0x61   : > { %854 = vrot.lane.b32.xlu1 %v852_v7, %s1650_s18  ;;  %787 = vrot.lane.b32.xlu0 %v785_v9, %s1650_s18  ;;  %v1047_v7 = vrot.slane %v1043_v62, 1  ;;  %v1181_v9 = vrot.slane %v1177_v1, 1  ;;  %v1998_v1 = vld [vmem:[%s1933_s4 + $0x10] sm:$0xff]  ;;  %s2029_s28 = sld [smem:[#allocation2 + $0x58]] }
  0x62   : > { %921 = vrot.lane.b32.xlu2 %v919_v11, %s1650_s18  ;;  %v1115_v11 = vsel %vm390_vm0, %v1113_v2, %v1114_v5  ;;  %v699_v2 = vstv %s1921_s11  ;;  %v703_v5 = vstv %s1935_s30  ;;  %s2017_s30 = sld [smem:[#allocation2 + $0x9]]  ;;  %v464_v27 = vstv %s1976_s20 }
  0x63   : > { %v1048_v13 = vsel %vm390_vm0, %v1046_v6, %v1047_v7  ;;  %v1182_v15 = vsel %vm390_vm0, %v1180_v8, %v1181_v9  ;;  %v374_v7 = vmul.f32 %v373_v57, %v1966_v34  ;;  %v453_v8 = vstv %s1956_s9  ;;  %s2033_s29 = sld [smem:[#allocation2 + $0xa]] }
  0x64   : > { %v397_v9 = vstv %s1959_s27  ;;  %s2037_s17 = sld [smem:[#allocation2 + $0x2e]] }
  0x65   : > { %v731_v57 = vstv %s2003_s23  ;;  %s2042_s19 = sld [smem:[#allocation2 + $0x5a]] }
  0x66   : > { %s2050_s26 = sld [smem:[#allocation2 + $0xc]] }
  0x67   : > { %s2058_s11 = sld [smem:[#allocation2 + $0x31]] }
  0x68   : > { %s2078_s1 = sld [smem:[#allocation2 + $0xf]] }
  0x69   : > { %870 = vrot.lane.b32.xlu1 %v868_v17, %s1650_s18  ;;  %803 = vrot.lane.b32.xlu0 %v801_v23, %s1650_s18  ;;  %v488_v17 = vstv %s1364_s12  ;;  %s1941_s12 = sld [smem:[#allocation2 + $0x6]]  ;;  %v1950_v23 = vld [vmem:[%s1933_s4] sm:$0xff] }
  0x6a   : > { %937 = vrot.lane.b32.xlu2 %v935_v24, %s1650_s18  ;;  %v489_v22 = vmul.f32 %v488_v17, %v1770_v0  ;;  %v492_v24 = vstv %s1901_s13  ;;  %v358_v51 = vmul.f32 %v357_v32, %v1950_v23  ;;  %s1983_s13 = sld [smem:[#allocation2 + $0x54]]  ;;  %v398_v29 = vmul.f32 %v397_v9, %v1950_v23 }
  0x6b   : > { %v493_v35 = vmul.f32 %v492_v24, %v1950_v23  ;;  %s2085_s9 = sld [smem:[#allocation2 + $0x5b]] }
  0x6c   : > { %s2090_s27 = sld [smem:[#allocation2 + $0x5d]] }
  0x6d   : > { %s2095_s20 = sld [smem:[#allocation2 + $0x34]] }
  0x6e   : > { %s2126_s23 = sld [smem:[#allocation2 + $0x36]] }
  0x70   : > { %v715_v32 = vstv %s1983_s13  ;;  %s2099_s13 = sld [smem:[#allocation2 + $0x10]] }
  0x71   : > { %905 = vrot.lane.b32.xlu1 %v904_v36, %s1650_s18  ;;  %838 = vrot.lane.b32.xlu0 %v837_v37, %s1650_s18  ;;  %v490_v36 = vadd.f32 %v489_v22, %v344_v21  ;;  %v1970_v37 = vld [vmem:[%s1933_s4 + $0x8] sm:$0x1]  ;;  %v2012_v21 = vmul.f32 %v1801_v33, %v699_v2  ;;  %v2015_v22 = vmul.f32 %v1998_v1, %v703_v5  ;;  %v565_v2 = vstv %s2017_s30  ;;  %s2134_s30 = sld [smem:[#allocation2 + $0x12]] }
  0x72   : > { %972 = vrot.lane.b32.xlu2 %v971_v38, %s1650_s18  ;;  %v531_v38 = vstv %s1919_s10  ;;  %s2053_s10 = sld [smem:[#allocation2 + $0x30]] }
  0x73   : > { %v532_v55 = vmul.f32 %v531_v38, %v1950_v23  ;;  %v533_v56 = vmul.f32 %v531_v38, %v1970_v37  ;;  %v494_v58 = vadd.f32 %v493_v35, %v490_v36  ;;  %v399_v36 = vmul.f32 %v397_v9, %v1970_v37 }
  0x79   : > { %1065 = vrot.lane.b32.xlu1 %v1063_v44, %s1650_s18  ;;  %998 = vrot.lane.b32.xlu0 %v996_v46, %s1650_s18  ;;  %v526_v44 = vrot.slane %v522_v26, 1  ;;  %v425_v46 = vstv %s1925_s0  ;;  %s1989_s0 = sld [smem:[#allocation2 + $0x27]]  ;;  %v455_v26 = vmul.f32 %v453_v8, %v1782_v10 }
  0x7a   : > { %1132 = vrot.lane.b32.xlu2 %v1130_v47, %s1650_s18  ;;  %v426_v61 = vmul.f32 %v425_v46, %v1950_v23  ;;  %v465_v46 = vmul.f32 %v464_v27, %v1950_v23 }
  0x7b   : > { %v527_v62 = vsel %vm390_vm0, %v525_v43, %v526_v44 }
  0x7f   : > { %v437_v43 = vstv %s1989_s0  ;;  %s2103_s0 = sld [smem:[#allocation2 + $0x60]] }
  0x81   : > { %1081 = vrot.lane.b32.xlu1 %v1079_v53, %s1650_s18  ;;  %1014 = vrot.lane.b32.xlu0 %v1012_v59, %s1650_s18  ;;  %v355_v53 = vadd.f32 %v354_v28, %v338_v31  ;;  %v385_v59 = vstv %s1941_s12  ;;  %v454_v28 = vmul.f32 %v453_v8, %v1770_v0  ;;  %s2073_s12 = sld [smem:[#allocation2 + $0xd]] }
  0x82   : > { %1148 = vrot.lane.b32.xlu2 %v1146_v60, %s1650_s18  ;;  %v387_v17 = vmul.f32 %v385_v59, %v1782_v10  ;;  %v386_v19 = vmul.f32 %v385_v59, %v1770_v0 }
  0x83   : > { %v359_v6 = vadd.f32 %v358_v51, %v355_v53  ;;  %v466_v51 = vmul.f32 %v464_v27, %v1970_v37  ;;  %v458_v52 = vrot.slane %v454_v28, 1  ;;  %v402_v53 = vrot.slane %v398_v29, 1  ;;  %v1378_v28 = vld [vmem:[%s1947_s2 + $0x10] sm:$0xff] }
  0x84   : > { %v392_v10 = vrot.slane %v387_v17, 1  ;;  %v719_v17 = vstv %s2009_s15  ;;  %v636_v29 = vstv %s2037_s17  ;;  %s2130_s15 = sld [smem:[#allocation2 + $0x61]] }
  0x85   : > { %s2153_s17 = sld [smem:[#allocation2 + $0x13]] }
  0x89   : > { %1116 = vrot.lane.b32.xlu1 %v1115_v11, %s1650_s18  ;;  %1049 = vrot.lane.b32.xlu0 %v1048_v13, %s1650_s18  ;;  %v536_v13 = vrot.slane %v532_v55, 1 }
  0x8a   : > { %1183 = vrot.lane.b32.xlu2 %v1182_v15, %s1650_s18  ;;  %s1923_s18 = sld [smem:[#allocation5 + $0x1]]  ;;  %v537_v15 = vrot.slane %v533_v56, 1 }
  0x8c   : > { %v1911_v16 = vpop.permute.xlu2 %448  ;;  %v538_v38 = vsel %vm390_vm0, %v536_v13, %v537_v15  ;;  %v2064_v13 = vld [vmem:[%s1933_s4 + $0x18] sm:$0x1]  ;;  %v742_v15 = vstv %s2029_s28  ;;  %s2141_s28 = sld [smem:[#allocation2 + $0x37]] }
  0x90   : > { %v341_v45 = vstv %s1923_s18  ;;  %s2067_s18 = sld [smem:[#allocation2 + $0x33]] }
  0x91   : > { %v423_v60 = vadd.f32 %v422_v41, %v341_v45  ;;  %v391_v41 = vrot.slane %v386_v19, 1  ;;  %v441_v45 = vstv %s1993_s14  ;;  %v632_v19 = vstv %s2021_s16  ;;  %s2113_s14 = sld [smem:[#allocation2 + $0x5e]] }
  0x92   : > { %v442_v37 = vmul.f32 %v441_v45, %v1966_v34  ;;  %v637_v45 = vmul.f32 %v1998_v1, %v636_v29  ;;  %s2137_s16 = sld [smem:[#allocation2 + $0x63]] }
  0x93   : > { %v427_v24 = vadd.f32 %v426_v61, %v423_v60  ;;  %v393_v23 = vsel %vm390_vm0, %v391_v41, %v392_v10  ;;  %v438_v60 = vmul.f32 %v437_v43, %v1774_v3  ;;  %v733_v3 = vmul.f32 %v1814_v42, %v731_v57 }
  0x94   : > { %v1927_v18 = vpop.permute.xlu2 %515  ;;  %v720_v43 = vmul.f32 %v1378_v28, %v719_v17  ;;  %v914_v17 = vstv %s2085_s9  ;;  %s2189_s9 = sld [smem:[#allocation2 + $0x67]] }
  0x9c   : > { %v1978_v47 = vpop.permute.xlu2 %550 }
  0xa3   : > { %v500_v11 = vpop.permute.xlu1 %499  ;;  %v365_v25 = vpop.permute.xlu0 %364 }
  0xa4   : > { %v502_v20 = vadd.f32 %v500_v11, %v494_v58  ;;  %v367_v31 = vadd.f32 %v365_v25, %v359_v6  ;;  %v2026_v35 = vpop.permute.xlu2 %710  ;;  %v403_v58 = vrot.slane %v399_v36, 1  ;;  %v732_v6 = vmul.f32 %v1801_v33, %v731_v57 }
  0xa5   : > { %v569_v25 = vstv %s2033_s29  ;;  %v744_v36 = vmul.f32 %v2064_v13, %v742_v15  ;;  %s2147_s29 = sld [smem:[#allocation2 + $0x39]] }
  0xa6   : > { %v506_v30 = vadd.f32 %v505_v49, %v502_v20  ;;  %v371_v44 = vadd.f32 %v370_v63, %v367_v31  ;;  %v459_v49 = vrot.slane %v455_v26, 1  ;;  %v469_v63 = vrot.slane %v465_v46, 1 }
  0xa7   : > { %v404_v11 = vsel %vm390_vm0, %v402_v53, %v403_v58  ;;  %v566_v20 = vmul.f32 %v1801_v33, %v565_v2  ;;  %v737_v31 = vrot.slane %v733_v3, 1  ;;  %v581_v46 = vstv %s2050_s26  ;;  %s2161_s26 = sld [smem:[#allocation2 + $0x64]] }
  0xa8   : > { %v510_v0 = vadd.f32 %v509_v54, %v506_v30  ;;  %v375_v56 = vadd.f32 %v374_v7, %v371_v44  ;;  %v2045_v54 = vmul.f32 %v1810_v40, %v715_v32  ;;  %v470_v7 = vrot.slane %v466_v51, 1 }
  0xa9   : > { %v460_v34 = vsel %vm390_vm0, %v458_v52, %v459_v49  ;;  %v736_v30 = vrot.slane %v732_v6, 1  ;;  %v743_v32 = vmul.f32 %v1998_v1, %v742_v15  ;;  %v910_v52 = vstv %s2042_s19  ;;  %v2120_v15 = vld [vmem:[%s1933_s4 + $0x20] sm:$0xff]  ;;  %s2157_s19 = sld [smem:[#allocation2 + $0x15]] }
  0xaa   : > { %v518_v55 = vadd.f32 %v1927_v18, %v510_v0  ;;  %v471_v41 = vsel %vm390_vm0, %v469_v63, %v470_v7  ;;  %v633_v0 = vmul.f32 %v1801_v33, %v632_v19  ;;  %v748_v57 = vrot.slane %v744_v36, 1 }
  0xab   : > { %v381_v59 = vpop.permute.xlu1 %380  ;;  %v433_v5 = vpop.permute.xlu0 %432  ;;  %v738_v53 = vsel %vm390_vm0, %v736_v30, %v737_v31  ;;  %v648_v58 = vstv %s2053_s10  ;;  %v585_v63 = vstv %s2073_s12  ;;  %v597_v6 = vstv %s2078_s1  ;;  %s2168_s10 = sld [smem:[#allocation2 + $0x66]] }
  0xac   : > { %v529_v61 = vadd.f32 %v527_v62, %v518_v55  ;;  %v383_v18 = vadd.f32 %v381_v59, %v375_v56  ;;  %v435_v8 = vadd.f32 %v433_v5, %v427_v24  ;;  %v2060_v9 = vpop.permute.xlu2 %726  ;;  %v747_v56 = vrot.slane %v743_v32, 1  ;;  %s2179_s12 = sld [smem:[#allocation2 + $0x16]] }
  0xad   : > { %v649_v7 = vmul.f32 %v1810_v40, %v648_v58  ;;  %v675_v30 = vstv %s2095_s20  ;;  %v915_v32 = vmul.f32 %v2120_v15, %v914_v17  ;;  %v843_v17 = vstv %s2126_s23  ;;  %s2182_s1 = sld [smem:[#allocation2 + $0x18]] }
  0xae   : > { %v540_v62 = vadd.f32 %v538_v38, %v529_v61  ;;  %v395_v27 = vadd.f32 %v393_v23, %v383_v18  ;;  %v439_v24 = vadd.f32 %v438_v60, %v435_v8  ;;  %v664_v60 = vstv %s2067_s18  ;;  %s2173_s18 = sld [smem:[#allocation2 + $0x3c]] }
  0xaf   : > { %v582_v61 = vmul.f32 %v1810_v40, %v581_v46  ;;  %v652_v18 = vstv %s2058_s11  ;;  %v749_v3 = vsel %vm390_vm0, %v747_v56, %v748_v57  ;;  %s2170_s11 = sld [smem:[#allocation2 + $0x3a]] }
  0xb0   : > { %v553_v26 = vadd.f32 %v1978_v47, %v540_v62  ;;  %v443_v10 = vadd.f32 %v442_v37, %v439_v24  ;;  %v570_v47 = vmul.f32 %v1998_v1, %v569_v25  ;;  %v406_v51 = vadd.f32 %v404_v11, %v395_v27  ;;  %s2196_s20 = sld [smem:[#allocation2 + $0x69]] }
  0xb1   : > { %v2106_v37 = vmul.f32 %v1834_v4, %v910_v52  ;;  %v666_v62 = vmul.f32 %v1814_v42, %v664_v60  ;;  %v653_v25 = vmul.f32 %v1378_v28, %v652_v18  ;;  %v599_v27 = vmul.f32 %v1814_v42, %v597_v6  ;;  %s2253_s23 = sld [smem:[#allocation2 + $0x1c]] }
  0xb2   : > { %v701_v38 = vadd.f32 %v2012_v21, %v553_v26  ;;  %v451_v49 = vadd.f32 %v1911_v16, %v443_v10  ;;  %v598_v26 = vmul.f32 %v1801_v33, %v597_v6  ;;  %v930_v52 = vstv %s2113_s14  ;;  %s2240_s14 = sld [smem:[#allocation2 + $0x3f]] }
  0xb3   : > { %v484_v44 = vpop.permute.xlu1 %483  ;;  %v417_v55 = vpop.permute.xlu0 %416 }
  0xb4   : > { %v705_v21 = vadd.f32 %v2015_v22, %v701_v38  ;;  %v462_v22 = vadd.f32 %v460_v34, %v451_v49  ;;  %v419_v23 = vadd.f32 %v417_v55, %v406_v51  ;;  %v762_v16 = vpop.permute.xlu2 %761  ;;  %v665_v34 = vmul.f32 %v1801_v33, %v664_v60  ;;  %v2144_v51 = vld [vmem:[%s1947_s2 + $0x20] sm:$0xff] }
  0xb5   : > { %v670_v38 = vrot.slane %v666_v62, 1 }
  0xb6   : > { %v713_v59 = vadd.f32 %v2026_v35, %v705_v21  ;;  %v473_v5 = vadd.f32 %v471_v41, %v462_v22  ;;  %v567_v35 = vadd.f32 %v566_v20, %v419_v23  ;;  %v926_v20 = vstv %s2090_s27  ;;  %s2193_s27 = sld [smem:[#allocation2 + $0x3d]] }
  0xb7   : > { %v669_v36 = vrot.slane %v665_v34, 1 }
  0xb8   : > { %v717_v2 = vadd.f32 %v2045_v54, %v713_v59  ;;  %v486_v11 = vadd.f32 %v484_v44, %v473_v5  ;;  %v586_v54 = vmul.f32 %v1378_v28, %v585_v63  ;;  %v571_v29 = vadd.f32 %v570_v47, %v567_v35 }
  0xb9   : > { %v608_v28 = vstv %s2099_s13  ;;  %v602_v47 = vrot.slane %v598_v26, 1  ;;  %v677_v44 = vmul.f32 %v2064_v13, %v675_v30  ;;  %v927_v59 = vmul.f32 %v1843_v12, %v926_v20  ;;  %s2202_s13 = sld [smem:[#allocation2 + $0x19]] }
  0xba   : > { %v721_v8 = vadd.f32 %v720_v43, %v717_v2  ;;  %v634_v24 = vadd.f32 %v633_v0, %v486_v11  ;;  %v603_v43 = vrot.slane %v599_v27, 1  ;;  %v676_v0 = vmul.f32 %v1998_v1, %v675_v30  ;;  %v2165_v2 = vld [vmem:[%s1933_s4 + $0x28] sm:$0x1] }
  0xbb   : > { %v644_v19 = vpop.permute.xlu1 %643  ;;  %v577_v31 = vpop.permute.xlu0 %576  ;;  %v609_v55 = vmul.f32 %v1998_v1, %v608_v28  ;;  %v610_v56 = vmul.f32 %v2064_v13, %v608_v28  ;;  %v671_v22 = vsel %vm390_vm0, %v669_v36, %v670_v38  ;;  %v681_v18 = vrot.slane %v677_v44, 1 }
  0xbc   : > { %v729_v40 = vadd.f32 %v2060_v9, %v721_v8  ;;  %v638_v42 = vadd.f32 %v637_v45, %v634_v24  ;;  %v579_v10 = vadd.f32 %v577_v31, %v571_v29  ;;  %v922_v41 = vpop.permute.xlu2 %921  ;;  %v942_v9 = vstv %s2103_s0  ;;  %s2208_s0 = sld [smem:[#allocation2 + $0x6a]] }
  0xbd   : > { %v943_v45 = vmul.f32 %v1834_v4, %v942_v9  ;;  %v604_v60 = vsel %vm390_vm0, %v602_v47, %v603_v43  ;;  %v680_v1 = vrot.slane %v676_v0, 1  ;;  %v953_v5 = vstv %s2130_s15  ;;  %s314_s15 = sand.u32 1, %s1638_s22  }
  0xbe   : > { %v740_v33 = vadd.f32 %v738_v53, %v729_v40  ;;  %v646_v21 = vadd.f32 %v644_v19, %v638_v42  ;;  %v583_v49 = vadd.f32 %v582_v61, %v579_v10  ;;  %v944_v53 = vmul.f32 %v1847_v14, %v942_v9 }
  0xbf   : > { %v931_v61 = vmul.f32 %v2144_v51, %v930_v52  ;;  %v947_v6 = vrot.slane %v943_v45, 1  ;;  %v614_v34 = vrot.slane %v610_v56, 1  ;;  %v776_v19 = vstv %s2134_s30  ;;  %s2259_s30 = sld [smem:[#allocation2 + $0x42]] }
  0xc0   : > { %v751_v46 = vadd.f32 %v749_v3, %v740_v33  ;;  %v650_v58 = vadd.f32 %v649_v7, %v646_v21  ;;  %v587_v63 = vadd.f32 %v586_v54, %v583_v49  ;;  %v948_v3 = vrot.slane %v944_v53, 1 }
  0xc1   : > { %v613_v7 = vrot.slane %v609_v55, 1  ;;  %v682_v54 = vsel %vm390_vm0, %v680_v1, %v681_v18  ;;  %v954_v20 = vmul.f32 %v2120_v15, %v953_v5  ;;  %v1121_v24 = vstv %s2137_s16  ;;  %s2261_s16 = sld [smem:[#allocation2 + $0x45]] }
  0xc2   : > { %v764_v57 = vadd.f32 %v762_v16, %v751_v46  ;;  %v654_v16 = vadd.f32 %v653_v25, %v650_v58  ;;  %v955_v25 = vmul.f32 %v2165_v2, %v953_v5  ;;  %v949_v29 = vsel %vm390_vm0, %v947_v6, %v948_v3  ;;  %v2205_v58 = vld [vmem:[%s1933_s4 + $0x30] sm:$0xff] }
  0xc3   : > { %v660_v23 = vpop.permute.xlu1 %659  ;;  %v593_v35 = vpop.permute.xlu0 %592  ;;  %v844_v30 = vmul.f32 %v1834_v4, %v843_v17  ;;  %v615_v31 = vsel %vm390_vm0, %v613_v7, %v614_v34  ;;  %v847_v38 = vstv %s2141_s28  ;;  %v780_v28 = vstv %s2153_s17  ;;  %s2266_s28 = sld [smem:[#allocation2 + $0x1e]] }
  0xc4   : > { %v912_v13 = vadd.f32 %v2106_v37, %v764_v57  ;;  %v662_v8 = vadd.f32 %v660_v23, %v654_v16  ;;  %v595_v37 = vadd.f32 %v593_v35, %v587_v63  ;;  %v938_v11 = vpop.permute.xlu2 %937  ;;  %v777_v42 = vmul.f32 %v1834_v4, %v776_v19  ;;  %s2271_s17 = sld [smem:[#allocation2 + $0x21]] }
  0xc5   : > { %v958_v10 = vrot.slane %v954_v20, 1  ;;  %v1122_v9 = vmul.f32 %v1867_v39, %v1121_v24  ;;  %v859_v44 = vstv %s2147_s29  ;;  %v848_v21 = vmul.f32 %v2120_v15, %v847_v38  ;;  %s1481_s29 = smul.u32 24, %s314_s15 }
  0xc6   : > { %v916_v62 = vadd.f32 %v915_v32, %v912_v13  ;;  %v673_v27 = vadd.f32 %v671_v22, %v662_v8  ;;  %v606_v40 = vadd.f32 %v604_v60, %v595_v37  ;;  %v781_v49 = vmul.f32 %v2120_v15, %v780_v28 }
  0xc7   : > { %v792_v52 = vstv %s2157_s19  ;;  %v1125_v45 = vstv %s2161_s26  ;;  %v860_v23 = vmul.f32 %v1843_v12, %v859_v44  ;;  %v863_v60 = vstv %s2170_s11  ;;  %s2274_s19 = sld [smem:[#allocation2 + $0x43]] }
  0xc8   : > { %v924_v26 = vadd.f32 %v922_v41, %v916_v62  ;;  %v684_v36 = vadd.f32 %v682_v54, %v673_v27  ;;  %v959_v41 = vrot.slane %v955_v25, 1  ;;  %v617_v0 = vadd.f32 %v615_v31, %v606_v40  ;;  %s2277_s26 = sld [smem:[#allocation2 + $0x46]] }
  0xc9   : > { %v1137_v13 = vstv %s2168_s10  ;;  %v808_v16 = vstv %s2182_s1  ;;  %v793_v63 = vmul.f32 %v1843_v12, %v792_v52  ;;  %v1126_v5 = vmul.f32 %v2205_v58, %v1125_v45  ;;  %s2280_s10 = sld [smem:[#allocation2 + $0x1f]] }
  0xca   : > { %v928_v32 = vadd.f32 %v927_v59, %v924_v26  ;;  %v875_v59 = vstv %s2173_s18  ;;  %v960_v22 = vsel %vm390_vm0, %v958_v10, %v959_v41  ;;  %v864_v34 = vmul.f32 %v2144_v51, %v863_v60  ;;  %s2283_s11 = sld [smem:[#allocation2 + $0x22]]  ;;  %s2288_s18 = scalar_lea.vmem [#allocation7], %s1481_s29 }
  0xcb   : > { %v695_v33 = vpop.permute.xlu1 %694  ;;  %v628_v46 = vpop.permute.xlu0 %627  ;;  %v876_v35 = vmul.f32 %v1834_v4, %v875_v59  ;;  %v877_v6 = vmul.f32 %v1847_v14, %v875_v59  ;;  %v1138_v37 = vmul.f32 %v1876_v48, %v1137_v13  ;;  %v809_v12 = vmul.f32 %v1834_v4, %v808_v16  ;;  %v2230_v4 = vld [vmem:[%s1933_s4 + $0x38] sm:$0x1]  ;;  %s2244_s4 = sld [smem:[#allocation2 + $0x1b]] }
  0xcc   : > { %v932_v47 = vadd.f32 %v931_v61, %v928_v32  ;;  %v697_v43 = vadd.f32 %v695_v33, %v684_v36  ;;  %v630_v56 = vadd.f32 %v628_v46, %v617_v0  ;;  %v973_v57 = vpop.permute.xlu2 %972  ;;  %v796_v61 = vstv %s2179_s12  ;;  %s1482_s12 = smul.u32 24, %s1709_s25  ;;  %s1206_s25 = sshll.u32 %s2288_s18, 4  ;;  %s1207_s25 = int_to_ptr.vmem [resolvable:$true] %s1206_s25 }
  0xcd   : > { %v797_v62 = vmul.f32 %v2144_v51, %v796_v61  ;;  %v886_v17 = vstv %s2193_s27  ;;  %v1153_v25 = vstv %s2196_s20  ;;  %v880_v27 = vrot.slane %v876_v35, 1 }
  0xce   : > { %v940_v53 = vadd.f32 %v938_v11, %v932_v47  ;;  %v845_v55 = vadd.f32 %v844_v30, %v697_v43  ;;  %v778_v18 = vadd.f32 %v777_v42, %v630_v56  ;;  %v810_v11 = vmul.f32 %v1847_v14, %v808_v16  ;;  %v2234_v14 = vld [vmem:[%s1947_s2 + $0x30] sm:$0xff]  ;;  %s2250_s2 = sld [smem:[#allocation2 + $0x40]]  ;;  %s1205_s27 = scalar_lea.hbm %s2358_s6, %s1482_s12 }
  0xcf   : > { %v881_v40 = vrot.slane %v877_v6, 1  ;;  %v1141_v24 = vstv %s2189_s9  ;;  %v819_v51 = vstv %s2202_s13  ;;  %v1164_v36 = vstv %s2208_s0  ;;  %s1208_s20 = sshll.u32 %s1205_s27, 4  ;;  %s1194_s13 = scalar_lea.sflag [#allocation3], %s314_s15  ;;  %s1209_s20 = int_to_ptr.hbm [resolvable:$true] %s1208_s20 }
  0xd0   : > { %v951_v1 = vadd.f32 %v949_v29, %v940_v53  ;;  %v849_v7 = vadd.f32 %v848_v21, %v845_v55  ;;  %v782_v20 = vadd.f32 %v781_v49, %v778_v18  ;;  %v1154_v38 = vmul.f32 %v1867_v39, %v1153_v25  ;;  %s1590_s0 = sshra.s32 %s1209_s20, 4  ;;  %s1591_s0 = int_to_ptr.hbm [resolvable:$true] %s1590_s0 }
  0xd1   : > { %v1155_v28 = vmul.f32 %v1880_v50, %v1153_v25  ;;  %v887_v33 = vmul.f32 %v2120_v15, %v886_v17  ;;  %v888_v42 = vmul.f32 %v2165_v2, %v886_v17  ;;  %v814_v47 = vrot.slane %v810_v11, 1  ;;  %p1597_p3 = scmp.lt.s32.totalorder %s1591_s0, %s2358_s6 }
  0xd2   : > { %v962_v3 = vadd.f32 %v960_v22, %v951_v1  ;;  %v820_v43 = vmul.f32 %v2120_v15, %v819_v51  ;;  %v821_v0 = vmul.f32 %v2165_v2, %v819_v51  ;;  %v1165_v44 = vmul.f32 %v2205_v58, %v1164_v36 }
  0xd3   : > { %v855_v8 = vpop.permute.xlu1 %854  ;;  %v788_v26 = vpop.permute.xlu0 %787  ;;  %v1166_v46 = vmul.f32 %v2230_v4, %v1164_v36  ;;  %v882_v49 = vsel %vm390_vm0, %v880_v27, %v881_v40  ;;  %v1142_v45 = vmul.f32 %v2234_v14, %v1141_v24  ;;  %v1158_v55 = vrot.slane %v1154_v38, 1 }
  0xd4   : > { %v975_v54 = vadd.f32 %v973_v57, %v962_v3  ;;  %v857_v19 = vadd.f32 %v855_v8, %v849_v7  ;;  %v790_v31 = vadd.f32 %v788_v26, %v782_v20  ;;  %v1133_v32 = vpop.permute.xlu2 %1132  ;;  %v1159_v56 = vrot.slane %v1155_v28, 1 }
  0xd5   : > { %v891_v57 = vrot.slane %v887_v33, 1  ;;  %v892_v59 = vrot.slane %v888_v42, 1  ;;  %v824_v61 = vrot.slane %v820_v43, 1  ;;  %v825_v1 = vrot.slane %v821_v0, 1 }
  0xd6   : > { %v1123_v29 = vadd.f32 %v1122_v9, %v975_v54  ;;  %v861_v30 = vadd.f32 %v860_v23, %v857_v19  ;;  %v794_v10 = vadd.f32 %v793_v63, %v790_v31  ;;  %v813_v9 = vrot.slane %v809_v12, 1 }
  0xd7   : > { %v1169_v18 = vrot.slane %v1165_v44, 1  ;;  %v1170_v13 = vrot.slane %v1166_v46, 1  ;;  %v1160_v6 = vsel %vm390_vm0, %v1158_v55, %v1159_v56  ;;  %v893_v3 = vsel %vm390_vm0, %v891_v57, %v892_v59 }
  0xd8   : > { %v1127_v41 = vadd.f32 %v1126_v5, %v1123_v29  ;;  %v865_v52 = vadd.f32 %v864_v34, %v861_v30  ;;  %v815_v22 = vsel %vm390_vm0, %v813_v9, %v814_v47  ;;  %v798_v23 = vadd.f32 %v797_v62, %v794_v10 }
  0xd9   : > { %v1054_v7 = vstv %s2240_s14  ;;  %v826_v8 = vsel %vm390_vm0, %v824_v61, %v825_v1  ;;  %v1171_v12 = vsel %vm390_vm0, %v1169_v18, %v1170_v13  ;;  %v1058_v20 = vstv %s2250_s2  ;;  %s1592_s14 = scalar_lea.hbm %s1591_s0, 24 }
  0xda   : > { %v1135_v21 = vadd.f32 %v1133_v32, %v1127_v41  ;;  %v1055_v17 = vmul.f32 %v1867_v39, %v1054_v7  ;;  %v991_v51 = vstv %s2253_s23  ;;  %v1059_v32 = vmul.f32 %v2205_v58, %v1058_v20  ;;  %p1593_p0 = scmp.ne.s32.totalorder %s1591_s0, %s1592_s14  ;;  %s1596_s23 = scalar_lea.hbm %s2358_s6, 48 }
  0xdb   : > { %v871_v53 = vpop.permute.xlu1 %870  ;;  %v804_v60 = vpop.permute.xlu0 %803  ;;  %v1070_v38 = vstv %s2259_s30  ;;  %v992_v33 = vmul.f32 %v2205_v58, %v991_v51  ;;  %v1086_v42 = vstv %s2261_s16  ;;  %v1003_v10 = vstv %s2266_s28  ;;  %p1598_p4 = scmp.lt.s32.totalorder %s1596_s23, %s1592_s14 }
  0xdc   : > { %v1139_v15 = vadd.f32 %v1138_v37, %v1135_v21  ;;  %v873_v2 = vadd.f32 %v871_v53, %v865_v52  ;;  %v806_v63 = vadd.f32 %v804_v60, %v798_v23  ;;  %v1149_v5 = vpop.permute.xlu2 %1148  ;;  %v987_v37 = vstv %s2244_s4  ;;  %p1594_p1 = pnand %p1593_p0, %p1726_p5 }
  0xdd   : > { %v988_v26 = vmul.f32 %v1867_v39, %v987_v37  ;;  %v1071_v41 = vmul.f32 %v1876_v48, %v1070_v38  ;;  %v1019_v47 = vstv %s2271_s17  ;;  %v1074_v0 = vstv %s2274_s19  ;;  %p1599_p7 = por %p1598_p4, %p1597_p3 }
  0xde   : > { %v884_v16 = vadd.f32 %v882_v49, %v873_v2  ;;  %v1143_v35 = vadd.f32 %v1142_v45, %v1139_v15  ;;  %v817_v34 = vadd.f32 %v815_v22, %v806_v63  ;;  %v1087_v44 = vmul.f32 %v1867_v39, %v1086_v42  ;;  %p1595_p2 = pneg %p1594_p1 }
  0xdf   : > { %v1088_v46 = vmul.f32 %v1880_v50, %v1086_v42  ;;  %v1004_v49 = vmul.f32 %v1876_v48, %v1003_v10  ;;  %v1097_v45 = vstv %s2277_s26  ;;  %v1007_v55 = vstv %s2280_s10 }
  0xe0   : > { %v1151_v62 = vadd.f32 %v1149_v5, %v1143_v35  ;;  %v895_v54 = vadd.f32 %v893_v3, %v884_v16  ;;  %v828_v27 = vadd.f32 %v826_v8, %v817_v34  ;;  %v1020_v56 = vmul.f32 %v1867_v39, %v1019_v47  ;;  %p1600_p8 = pnand %p1599_p7, %p1595_p2 }
  0xe1   : > { %v1021_v57 = vmul.f32 %v1880_v50, %v1019_v47  ;;  %v1075_v2 = vmul.f32 %v2234_v14, %v1074_v0  ;;  %v1030_v22 = vstv %s2283_s11  ;;  %v1091_v23 = vrot.slane %v1087_v44, 1 }
  0xe2   : > { %v1162_v11 = vadd.f32 %v1160_v6, %v1151_v62  ;;  %v1092_v60 = vrot.slane %v1088_v46, 1  ;;  %v1098_v61 = vmul.f32 %v2205_v58, %v1097_v45  ;;  %v1099_v48 = vmul.f32 %v2230_v4, %v1097_v45 }
  0xe3   : > { %v906_v19 = vpop.permute.xlu1 %905  ;;  %v839_v24 = vpop.permute.xlu0 %838  ;;  %v1008_v18 = vmul.f32 %v2234_v14, %v1007_v55  ;;  %v1024_v13 = vrot.slane %v1020_v56, 1  ;;  %v1025_v16 = vrot.slane %v1021_v57, 1  ;;  %v1031_v39 = vmul.f32 %v2205_v58, %v1030_v22 }
  0xe4   : > { %v908_v25 = vadd.f32 %v906_v19, %v895_v54  ;;  %v1173_v40 = vadd.f32 %v1171_v12, %v1162_v11  ;;  %v841_v30 = vadd.f32 %v839_v24, %v828_v27  ;;  %v1184_v31 = vpop.permute.xlu2 %1183  ;;  %v1032_v50 = vmul.f32 %v2230_v4, %v1030_v22 }
  0xe5   : > { %v1093_v5 = vsel %vm390_vm0, %v1091_v23, %v1092_v60  ;;  %v1102_v6 = vrot.slane %v1098_v61, 1  ;;  %v1103_v3 = vrot.slane %v1099_v48, 1  ;;  %v1026_v62 = vsel %vm390_vm0, %v1024_v13, %v1025_v16 }
  0xe6   : > { %v1056_v29 = vadd.f32 %v1055_v17, %v908_v25  ;;  %v1186_v36 = vadd.f32 %v1184_v31, %v1173_v40  ;;  %v989_v28 = vadd.f32 %v988_v26, %v841_v30  ;;  %v1035_v14 = vrot.slane %v1031_v39, 1 }
  0xe7   : > { %v1036_v37 = vrot.slane %v1032_v50, 1  ;;  %v1104_v4 = vsel %vm390_vm0, %v1102_v6, %v1103_v3 }
  0xe8   : > { %1473 = vst.msk [vmem:[%s2288_s18 + $0x10] sm:$0xff] %vm1187_vm1, %v1186_v36  ;;  %v1060_v9 = vadd.f32 %v1059_v32, %v1056_v29  ;;  %v993_v52 = vadd.f32 %v992_v33, %v989_v28 }
  0xe9   : > { %v1037_v17 = vsel %vm390_vm0, %v1035_v14, %v1036_v37 }
  0xeb   : > { %v1066_v43 = vpop.permute.xlu1 %1065  ;;  %v999_v53 = vpop.permute.xlu0 %998 }
  0xec   : > { %v1068_v21 = vadd.f32 %v1066_v43, %v1060_v9  ;;  %v1001_v15 = vadd.f32 %v999_v53, %v993_v52 }
  0xee   : > { %v1072_v59 = vadd.f32 %v1071_v41, %v1068_v21  ;;  %v1005_v1 = vadd.f32 %v1004_v49, %v1001_v15 }
  0xf0   : > { %v1076_v63 = vadd.f32 %v1075_v2, %v1072_v59  ;;  %v1009_v34 = vadd.f32 %v1008_v18, %v1005_v1 }
  0xf3   : > { %v1082_v35 = vpop.permute.xlu1 %1081  ;;  %v1015_v8 = vpop.permute.xlu0 %1014 }
  0xf4   : > { %v1084_v7 = vadd.f32 %v1082_v35, %v1076_v63  ;;  %v1017_v58 = vadd.f32 %v1015_v8, %v1009_v34 }
  0xf6   : > { %v1095_v12 = vadd.f32 %v1093_v5, %v1084_v7  ;;  %v1028_v11 = vadd.f32 %v1026_v62, %v1017_v58 }
  0xf8   : > { %v1106_v54 = vadd.f32 %v1104_v4, %v1095_v12  ;;  %v1039_v25 = vadd.f32 %v1037_v17, %v1028_v11 }
  0xfb   : > { %v1117_v19 = vpop.permute.xlu1 %1116  ;;  %v1050_v26 = vpop.permute.xlu0 %1049 }
  0xfc   : > { %v1119_v20 = vadd.f32 %v1117_v19, %v1106_v54  ;;  %v1052_v27 = vadd.f32 %v1050_v26, %v1039_v25 }
  0xfe   : > { %1472 = vst.msk [vmem:[%s2288_s18 + $0x8] sm:$0xff] %vm1187_vm1, %v1119_v20 }
  0xff   : > { %1188 = vst.msk [vmem:[%s2288_s18] sm:$0xff] %vm1187_vm1, %v1052_v27 }
 0x100   : > { %1603 = shalt.err (!%p1600_p8)
}
 0x101   : > { %s1651_s15 = smov 128   ;;  %s1652_s28 = smov 8  }
 0x102   : > { %1491 = dma.vmem_to_hbm [thread:$0]  (%p1726_p5), %s1207_s25, 384, %s1209_s20, %s1194_s13, %s1651_s15, %s1651_s15, %s1652_s28  }
 0x103 PF: > { %p1508_p9 = scmp.ge.s32.totalorder %s1646_s24, 2  ;;  %s1223_s29 = sand.u32 1, %s1634_s21  }
 0x104   : > { %s1224_s17 = scalar_lea.sflag [#allocation3], %s1223_s29 }
 0x105   : > { %p1501_p10 = pnand %p1508_p9, %p1730_p6 }
 0x107   : > { %p1502_p11 = pneg %p1501_p10 }
 0x109   : > { %1629 = dma.done.wait (%p1502_p11), %s1224_s17, 384  }
 0x10a   : > { %1631 = vsyncadd (%p1502_p11), %s1224_s17, 4294966912  ;;  %s2375_s24 = sld [smem:[#allocation12_spill]]  ;;  %s2378_s21 = smov %s1638_s22 }
 0x10b   : > { %s2376_s19 = sld [smem:[#allocation11_spill]] }
 0x10c   : > { %s2377_s23 = sld [smem:[#allocation13_spill]] }
 0x110   : > { %p18_p12 = scmp.ge.s32.totalorder %s2375_s24, 4  }
 0x111   : > { %s2379_s22 = smov %s2376_s19 }
 0x112   :  { %20 = sbr.rel (!%p18_p12) target bundleno = 10 (0xa), region = 111 }
 0x117   :  { %1230 = vsyncpa [#allocation3], 1 }
 0x118   :  { %1232 = vsyncpa [#allocation3 + $0x1], 1 }
 0x119   :  { %1233 = vsyncpa [#allocation4], 1 }
 0x11a   :  { %1235 = vsyncpa [#allocation4 + $0x1], 1 }
 0x11b   :  { %1236 = vsyncpa [#allocation6], 1 }

</bundles_post_ra>
